<compile_context>
chip_gen: v5e
topology: v5e:2x2
jax: 0.10.0
libtpu: 0.0.40
codegen_flags: <defaults>
</compile_context>

<pallas_src>
import functools

import jax
import jax.numpy as jnp
from jax.experimental import pallas as pl
from jax.experimental.pallas import tpu as pltpu

_HIDDEN = (512, 256, 128, 64)
_LANE = 128


def _pad_to(n, m):
    return ((n + m - 1) // m) * m


def mlp_kernel(x_ref,
               w1_ref, b1_ref, w2_ref, b2_ref, w3_ref, b3_ref,
               w4_ref, b4_ref, w5_ref, b5_ref,
               m1_ref, m2_ref, m3_ref, m4_ref,
               o_ref):
    def layer(h_bf16, w_ref, b_ref, m_ref):
        # linear (bf16 MXU, f32 accumulate) -> tanh -> dropout (mask in {0, 2})
        z = jnp.dot(h_bf16, w_ref[...], preferred_element_type=jnp.float32)
        z = z + b_ref[...]
        z = jnp.tanh(z) * m_ref[...].astype(jnp.float32)
        return z.astype(jnp.bfloat16)

    h = x_ref[...]                                   # (TM, 512) bf16, padded
    h = layer(h, w1_ref, b1_ref, m1_ref)             # 512 -> 512
    h = layer(h, w2_ref, b2_ref, m2_ref)             # 512 -> 256
    h = layer(h, w3_ref, b3_ref, m3_ref)             # 256 -> 128
    h = layer(h, w4_ref, b4_ref, m4_ref)             # 128 ->  64
    y = jnp.dot(h, w5_ref[...], preferred_element_type=jnp.float32) + b5_ref[...]
    o_ref[...] = y                                   #  64 -> 128 (padded out)


@jax.jit
def mlp_forward(x, params, dropout_key):
    """x: (B, 400) f32. params: list of (w, b), w: (in, out), b: (1, out)."""
    B, in_dim = x.shape
    out_dim = params[-1][0].shape[1]

    in_pad = _pad_to(in_dim, _LANE)      # 400 -> 512
    out_pad = _pad_to(out_dim, _LANE)    #  12 -> 128

    # Batch tiling: one tile if small, else TM=256 tiles ("parallel" axis).
    TM = 256
    if B <= TM:
        B_pad = _pad_to(B, 8)
        TM = B_pad
    else:
        B_pad = _pad_to(B, TM)
    grid = (B_pad // TM,)

    # Pad + cast input to bf16, features on the lane axis.
    x_p = jnp.zeros((B_pad, in_pad), jnp.bfloat16)
    x_p = x_p.at[:B, :in_dim].set(x.astype(jnp.bfloat16))

    # Weights: bf16 operands, f32 biases.  Pad w1 rows and w5/b5 output lanes.
    (w1, b1), (w2, b2), (w3, b3), (w4, b4), (w5, b5) = params
    w1_p = jnp.zeros((in_pad, w1.shape[1]), jnp.bfloat16).at[:in_dim].set(
        w1.astype(jnp.bfloat16))
    w5_p = jnp.zeros((w5.shape[0], out_pad), jnp.bfloat16).at[:, :out_dim].set(
        w5.astype(jnp.bfloat16))
    b5_p = jnp.zeros((1, out_pad), jnp.float32).at[:, :out_dim].set(
        b5.astype(jnp.float32))
    weights = [
        (w1_p, b1.astype(jnp.float32)),
        (w2.astype(jnp.bfloat16), b2.astype(jnp.float32)),
        (w3.astype(jnp.bfloat16), b3.astype(jnp.float32)),
        (w4.astype(jnp.bfloat16), b4.astype(jnp.float32)),
        (w5_p, b5_p),
    ]

    # Dropout keep masks: Bernoulli(keep=0.5) * 1/(1-p) = {0, 2}, bf16.
    keys = jax.random.split(dropout_key, len(_HIDDEN))
    masks = [
        jax.random.bernoulli(k, 0.5, (B_pad, h)).astype(jnp.bfloat16)
        * jnp.bfloat16(2.0)
        for k, h in zip(keys, _HIDDEN)
    ]

    flat = [x_p]
    in_specs = [pl.BlockSpec((TM, in_pad), lambda i: (i, 0))]
    for (w, b) in weights:                       # resident across batch tiles
        flat += [w, b]
        in_specs += [
            pl.BlockSpec(w.shape, lambda i: (0, 0)),
            pl.BlockSpec(b.shape, lambda i: (0, 0)),
        ]
    for m in masks:                              # per-tile dropout masks
        flat += [m]
        in_specs += [pl.BlockSpec((TM, m.shape[1]), lambda i: (i, 0))]

    dims = [in_pad] + list(_HIDDEN) + [out_pad]
    flops = 2 * B_pad * sum(a * b for a, b in zip(dims[:-1], dims[1:]))
    transcendentals = B_pad * sum(_HIDDEN)
    bytes_accessed = (
        x_p.size * 2
        + sum(w.size * 2 + b.size * 4 for (w, b) in weights)
        + sum(m.size * 2 for m in masks)
        + B_pad * out_pad * 4
    )

    y_pad = pl.pallas_call(
        mlp_kernel,
        out_shape=jax.ShapeDtypeStruct((B_pad, out_pad), jnp.float32),
        grid=grid,
        in_specs=in_specs,
        out_specs=pl.BlockSpec((TM, out_pad), lambda i: (i, 0)),
        compiler_params=pltpu.CompilerParams(
            dimension_semantics=("parallel",),
        ),
        cost_estimate=pl.CostEstimate(
            flops=flops,
            transcendentals=transcendentals,
            bytes_accessed=bytes_accessed,
        ),
    )(*flat)

    return y_pad[:B, :out_dim]


def init_params(key, input_dim=400, output_dim=12):
    """Deterministic parameter init (PyTorch-Linear-like uniform fan-in)."""
    dims = [input_dim, 512, 256, 128, 64, output_dim]
    params = []
    for i in range(len(dims) - 1):
        fan_in, fan_out = dims[i], dims[i + 1]
        key, kw, kb = jax.random.split(key, 3)
        bound = 1.0 / jnp.sqrt(jnp.float32(fan_in))
        # stored pre-transposed: (in_features, out_features)
        w = jax.random.uniform(kw, (fan_in, fan_out), jnp.float32, -bound, bound)
        b = jax.random.uniform(kb, (1, fan_out), jnp.float32, -bound, bound)
        params.append((w, b))
    return params


if __name__ == "__main__":
    key = jax.random.PRNGKey(0)
    kx, kp, kd = jax.random.split(key, 3)

    B, INPUT_DIM, OUTPUT_DIM = 8, 400, 12
    x = jax.random.normal(kx, (B, INPUT_DIM), dtype=jnp.float32)
    params = init_params(kp, INPUT_DIM, OUTPUT_DIM)

    y = mlp_forward(x, params, kd)
    jax.block_until_ready(y)

    assert y.shape == (B, OUTPUT_DIM), y.shape
    assert jnp.all(jnp.isfinite(y)), "non-finite output"
    print("KERNEL_OK")
</pallas_src>

<mosaic_0001>
module attributes {stable_mosaic.version = 11 : i64} {
  func.func @mlp_kernel(%arg0: i32, %arg1: memref<8x512xbf16, #tpu.memory_space<vmem>>, %arg2: memref<512x512xbf16, #tpu.memory_space<vmem>>, %arg3: memref<1x512xf32, #tpu.memory_space<vmem>>, %arg4: memref<512x256xbf16, #tpu.memory_space<vmem>>, %arg5: memref<1x256xf32, #tpu.memory_space<vmem>>, %arg6: memref<256x128xbf16, #tpu.memory_space<vmem>>, %arg7: memref<1x128xf32, #tpu.memory_space<vmem>>, %arg8: memref<128x64xbf16, #tpu.memory_space<vmem>>, %arg9: memref<1x64xf32, #tpu.memory_space<vmem>>, %arg10: memref<64x128xbf16, #tpu.memory_space<vmem>>, %arg11: memref<1x128xf32, #tpu.memory_space<vmem>>, %arg12: memref<8x512xbf16, #tpu.memory_space<vmem>>, %arg13: memref<8x256xbf16, #tpu.memory_space<vmem>>, %arg14: memref<8x128xbf16, #tpu.memory_space<vmem>>, %arg15: memref<8x64xbf16, #tpu.memory_space<vmem>>, %arg16: memref<8x128xf32, #tpu.memory_space<vmem>>) attributes {dimension_semantics = [#tpu.dimension_semantics<parallel>], iteration_bounds = array<i64: 1>, scalar_prefetch = 0 : i64, scratch_operands = 0 : i64, tpu.core_type = #tpu.core_type<tc>, window_params = [{transform_indices = @transform_0, window_bounds = array<i64: 8, 512>}, {pipeline_mode = #tpu.pipeline_mode<synchronous>, transform_indices = @transform_1, window_bounds = array<i64: 512, 512>}, {pipeline_mode = #tpu.pipeline_mode<synchronous>, transform_indices = @transform_2, window_bounds = array<i64: 1, 512>}, {pipeline_mode = #tpu.pipeline_mode<synchronous>, transform_indices = @transform_3, window_bounds = array<i64: 512, 256>}, {pipeline_mode = #tpu.pipeline_mode<synchronous>, transform_indices = @transform_4, window_bounds = array<i64: 1, 256>}, {pipeline_mode = #tpu.pipeline_mode<synchronous>, transform_indices = @transform_5, window_bounds = array<i64: 256, 128>}, {pipeline_mode = #tpu.pipeline_mode<synchronous>, transform_indices = @transform_6, window_bounds = array<i64: 1, 128>}, {pipeline_mode = #tpu.pipeline_mode<synchronous>, transform_indices = @transform_7, window_bounds = array<i64: 128, 64>}, {pipeline_mode = #tpu.pipeline_mode<synchronous>, transform_indices = @transform_8, window_bounds = array<i64: 1, 64>}, {pipeline_mode = #tpu.pipeline_mode<synchronous>, transform_indices = @transform_9, window_bounds = array<i64: 64, 128>}, {pipeline_mode = #tpu.pipeline_mode<synchronous>, transform_indices = @transform_10, window_bounds = array<i64: 1, 128>}, {transform_indices = @transform_11, window_bounds = array<i64: 8, 512>}, {transform_indices = @transform_12, window_bounds = array<i64: 8, 256>}, {transform_indices = @transform_13, window_bounds = array<i64: 8, 128>}, {transform_indices = @transform_14, window_bounds = array<i64: 8, 64>}, {transform_indices = @transform_15, window_bounds = array<i64: 8, 128>}]} {
    %c0 = arith.constant 0 : index
    %c0_0 = arith.constant 0 : index
    %0 = vector.load %arg1[%c0, %c0_0] : memref<8x512xbf16, #tpu.memory_space<vmem>>, vector<8x512xbf16>
    %c0_1 = arith.constant 0 : index
    %c0_2 = arith.constant 0 : index
    %1 = vector.load %arg2[%c0_1, %c0_2] : memref<512x512xbf16, #tpu.memory_space<vmem>>, vector<512x512xbf16>
    %cst = arith.constant dense<0.000000e+00> : vector<8x512xf32>
    %2 = tpu.matmul %0, %1, %cst {dimension_numbers = #tpu.dot_dimension_numbers<[1], [0], [0], [1], [0, 0, 1, 1], [], []>} : vector<8x512xbf16>, vector<512x512xbf16>, vector<8x512xf32> -> vector<8x512xf32>
    %c0_3 = arith.constant 0 : index
    %c0_4 = arith.constant 0 : index
    %3 = vector.load %arg3[%c0_3, %c0_4] : memref<1x512xf32, #tpu.memory_space<vmem>>, vector<1x512xf32>
    %4 = vector.broadcast %3 : vector<1x512xf32> to vector<8x512xf32>
    %5 = arith.addf %2, %4 : vector<8x512xf32>
    %6 = math.tanh %5 : vector<8x512xf32>
    %c0_5 = arith.constant 0 : index
    %c0_6 = arith.constant 0 : index
    %7 = vector.load %arg12[%c0_5, %c0_6] : memref<8x512xbf16, #tpu.memory_space<vmem>>, vector<8x512xbf16>
    %8 = arith.extf %7 : vector<8x512xbf16> to vector<8x512xf32>
    %9 = arith.mulf %6, %8 : vector<8x512xf32>
    %10 = arith.truncf %9 : vector<8x512xf32> to vector<8x512xbf16>
    %c0_7 = arith.constant 0 : index
    %c0_8 = arith.constant 0 : index
    %11 = vector.load %arg4[%c0_7, %c0_8] : memref<512x256xbf16, #tpu.memory_space<vmem>>, vector<512x256xbf16>
    %cst_9 = arith.constant dense<0.000000e+00> : vector<8x256xf32>
    %12 = tpu.matmul %10, %11, %cst_9 {dimension_numbers = #tpu.dot_dimension_numbers<[1], [0], [0], [1], [0, 0, 1, 1], [], []>} : vector<8x512xbf16>, vector<512x256xbf16>, vector<8x256xf32> -> vector<8x256xf32>
    %c0_10 = arith.constant 0 : index
    %c0_11 = arith.constant 0 : index
    %13 = vector.load %arg5[%c0_10, %c0_11] : memref<1x256xf32, #tpu.memory_space<vmem>>, vector<1x256xf32>
    %14 = vector.broadcast %13 : vector<1x256xf32> to vector<8x256xf32>
    %15 = arith.addf %12, %14 : vector<8x256xf32>
    %16 = math.tanh %15 : vector<8x256xf32>
    %c0_12 = arith.constant 0 : index
    %c0_13 = arith.constant 0 : index
    %17 = vector.load %arg13[%c0_12, %c0_13] : memref<8x256xbf16, #tpu.memory_space<vmem>>, vector<8x256xbf16>
    %18 = arith.extf %17 : vector<8x256xbf16> to vector<8x256xf32>
    %19 = arith.mulf %16, %18 : vector<8x256xf32>
    %20 = arith.truncf %19 : vector<8x256xf32> to vector<8x256xbf16>
    %c0_14 = arith.constant 0 : index
    %c0_15 = arith.constant 0 : index
    %21 = vector.load %arg6[%c0_14, %c0_15] : memref<256x128xbf16, #tpu.memory_space<vmem>>, vector<256x128xbf16>
    %cst_16 = arith.constant dense<0.000000e+00> : vector<8x128xf32>
    %22 = tpu.matmul %20, %21, %cst_16 {dimension_numbers = #tpu.dot_dimension_numbers<[1], [0], [0], [1], [0, 0, 1, 1], [], []>} : vector<8x256xbf16>, vector<256x128xbf16>, vector<8x128xf32> -> vector<8x128xf32>
    %c0_17 = arith.constant 0 : index
    %c0_18 = arith.constant 0 : index
    %23 = vector.load %arg7[%c0_17, %c0_18] : memref<1x128xf32, #tpu.memory_space<vmem>>, vector<1x128xf32>
    %24 = vector.broadcast %23 : vector<1x128xf32> to vector<8x128xf32>
    %25 = arith.addf %22, %24 : vector<8x128xf32>
    %26 = math.tanh %25 : vector<8x128xf32>
    %c0_19 = arith.constant 0 : index
    %c0_20 = arith.constant 0 : index
    %27 = vector.load %arg14[%c0_19, %c0_20] : memref<8x128xbf16, #tpu.memory_space<vmem>>, vector<8x128xbf16>
    %28 = arith.extf %27 : vector<8x128xbf16> to vector<8x128xf32>
    %29 = arith.mulf %26, %28 : vector<8x128xf32>
    %30 = arith.truncf %29 : vector<8x128xf32> to vector<8x128xbf16>
    %c0_21 = arith.constant 0 : index
    %c0_22 = arith.constant 0 : index
    %31 = vector.load %arg8[%c0_21, %c0_22] : memref<128x64xbf16, #tpu.memory_space<vmem>>, vector<128x64xbf16>
    %cst_23 = arith.constant dense<0.000000e+00> : vector<8x64xf32>
    %32 = tpu.matmul %30, %31, %cst_23 {dimension_numbers = #tpu.dot_dimension_numbers<[1], [0], [0], [1], [0, 0, 1, 1], [], []>} : vector<8x128xbf16>, vector<128x64xbf16>, vector<8x64xf32> -> vector<8x64xf32>
    %c0_24 = arith.constant 0 : index
    %c0_25 = arith.constant 0 : index
    %33 = vector.load %arg9[%c0_24, %c0_25] : memref<1x64xf32, #tpu.memory_space<vmem>>, vector<1x64xf32>
    %34 = vector.broadcast %33 : vector<1x64xf32> to vector<8x64xf32>
    %35 = arith.addf %32, %34 : vector<8x64xf32>
    %36 = math.tanh %35 : vector<8x64xf32>
    %c0_26 = arith.constant 0 : index
    %c0_27 = arith.constant 0 : index
    %37 = vector.load %arg15[%c0_26, %c0_27] : memref<8x64xbf16, #tpu.memory_space<vmem>>, vector<8x64xbf16>
    %38 = arith.extf %37 : vector<8x64xbf16> to vector<8x64xf32>
    %39 = arith.mulf %36, %38 : vector<8x64xf32>
    %40 = arith.truncf %39 : vector<8x64xf32> to vector<8x64xbf16>
    %c0_28 = arith.constant 0 : index
    %c0_29 = arith.constant 0 : index
    %41 = vector.load %arg10[%c0_28, %c0_29] : memref<64x128xbf16, #tpu.memory_space<vmem>>, vector<64x128xbf16>
    %cst_30 = arith.constant dense<0.000000e+00> : vector<8x128xf32>
    %42 = tpu.matmul %40, %41, %cst_30 {dimension_numbers = #tpu.dot_dimension_numbers<[1], [0], [0], [1], [0, 0, 1, 1], [], []>} : vector<8x64xbf16>, vector<64x128xbf16>, vector<8x128xf32> -> vector<8x128xf32>
    %c0_31 = arith.constant 0 : index
    %c0_32 = arith.constant 0 : index
    %43 = vector.load %arg11[%c0_31, %c0_32] : memref<1x128xf32, #tpu.memory_space<vmem>>, vector<1x128xf32>
    %44 = vector.broadcast %43 : vector<1x128xf32> to vector<8x128xf32>
    %45 = arith.addf %42, %44 : vector<8x128xf32>
    %c0_33 = arith.constant 0 : index
    %c0_34 = arith.constant 0 : index
    %46 = vector.load %arg16[%c0_33, %c0_34] : memref<8x128xf32, #tpu.memory_space<vmem>>, vector<8x128xf32>
    tpu.vector_store %arg16[%c0_33, %c0_34], %45 {strides = array<i32>} : memref<8x128xf32, #tpu.memory_space<vmem>>, vector<8x128xf32>,
    return
  }
  func.func @transform_0(%arg0: i32) -> (i32, i32) {
    %c0_i32 = arith.constant 0 : i32
    %c0_i32_0 = arith.constant 0 : i32
    return %arg0, %c0_i32 : i32, i32
  }
  func.func @transform_1(%arg0: i32) -> (i32, i32) {
    %c0_i32 = arith.constant 0 : i32
    %c0_i32_0 = arith.constant 0 : i32
    %c0_i32_1 = arith.constant 0 : i32
    return %c0_i32, %c0_i32_0 : i32, i32
  }
  func.func @transform_2(%arg0: i32) -> (i32, i32) {
    %c0_i32 = arith.constant 0 : i32
    %c0_i32_0 = arith.constant 0 : i32
    %c0_i32_1 = arith.constant 0 : i32
    return %c0_i32, %c0_i32_0 : i32, i32
  }
  func.func @transform_3(%arg0: i32) -> (i32, i32) {
    %c0_i32 = arith.constant 0 : i32
    %c0_i32_0 = arith.constant 0 : i32
    %c0_i32_1 = arith.constant 0 : i32
    return %c0_i32, %c0_i32_0 : i32, i32
  }
  func.func @transform_4(%arg0: i32) -> (i32, i32) {
    %c0_i32 = arith.constant 0 : i32
    %c0_i32_0 = arith.constant 0 : i32
    %c0_i32_1 = arith.constant 0 : i32
    return %c0_i32, %c0_i32_0 : i32, i32
  }
  func.func @transform_5(%arg0: i32) -> (i32, i32) {
    %c0_i32 = arith.constant 0 : i32
    %c0_i32_0 = arith.constant 0 : i32
    %c0_i32_1 = arith.constant 0 : i32
    return %c0_i32, %c0_i32_0 : i32, i32
  }
  func.func @transform_6(%arg0: i32) -> (i32, i32) {
    %c0_i32 = arith.constant 0 : i32
    %c0_i32_0 = arith.constant 0 : i32
    %c0_i32_1 = arith.constant 0 : i32
    return %c0_i32, %c0_i32_0 : i32, i32
  }
  func.func @transform_7(%arg0: i32) -> (i32, i32) {
    %c0_i32 = arith.constant 0 : i32
    %c0_i32_0 = arith.constant 0 : i32
    %c0_i32_1 = arith.constant 0 : i32
    return %c0_i32, %c0_i32_0 : i32, i32
  }
  func.func @transform_8(%arg0: i32) -> (i32, i32) {
    %c0_i32 = arith.constant 0 : i32
    %c0_i32_0 = arith.constant 0 : i32
    %c0_i32_1 = arith.constant 0 : i32
    return %c0_i32, %c0_i32_0 : i32, i32
  }
  func.func @transform_9(%arg0: i32) -> (i32, i32) {
    %c0_i32 = arith.constant 0 : i32
    %c0_i32_0 = arith.constant 0 : i32
    %c0_i32_1 = arith.constant 0 : i32
    return %c0_i32, %c0_i32_0 : i32, i32
  }
  func.func @transform_10(%arg0: i32) -> (i32, i32) {
    %c0_i32 = arith.constant 0 : i32
    %c0_i32_0 = arith.constant 0 : i32
    %c0_i32_1 = arith.constant 0 : i32
    return %c0_i32, %c0_i32_0 : i32, i32
  }
  func.func @transform_11(%arg0: i32) -> (i32, i32) {
    %c0_i32 = arith.constant 0 : i32
    %c0_i32_0 = arith.constant 0 : i32
    return %arg0, %c0_i32 : i32, i32
  }
  func.func @transform_12(%arg0: i32) -> (i32, i32) {
    %c0_i32 = arith.constant 0 : i32
    %c0_i32_0 = arith.constant 0 : i32
    return %arg0, %c0_i32 : i32, i32
  }
  func.func @transform_13(%arg0: i32) -> (i32, i32) {
    %c0_i32 = arith.constant 0 : i32
    %c0_i32_0 = arith.constant 0 : i32
    return %arg0, %c0_i32 : i32, i32
  }
  func.func @transform_14(%arg0: i32) -> (i32, i32) {
    %c0_i32 = arith.constant 0 : i32
    %c0_i32_0 = arith.constant 0 : i32
    return %arg0, %c0_i32 : i32, i32
  }
  func.func @transform_15(%arg0: i32) -> (i32, i32) {
    %c0_i32 = arith.constant 0 : i32
    %c0_i32_0 = arith.constant 0 : i32
    return %arg0, %c0_i32 : i32, i32
  }
}

</mosaic_0001>

<bundles_post_ra>
// kernel: mlp_forward.3
= control target key start
LH: loop header
LB: loop body
LE: loop exit
PB: predicated region body
PF: predicated region fallthrough
CT: control target
= control target key end

     0   :  { %s4431_s0 = inlined_call_operand.vmem [shape: bf16[8,512], index: 0, kind: input, shape index: {}]   ;;  %s4432_s1 = inlined_call_operand.vmem [shape: bf16[512,512], index: 1, kind: input, shape index: {}]   ;;  %s4433_s2 = inlined_call_operand.vmem [shape: f32[1,512], index: 2, kind: input, shape index: {}]   ;;  %s4434_s3 = inlined_call_operand.vmem [shape: bf16[512,256], index: 3, kind: input, shape index: {}]   ;;  %s4435_s4 = inlined_call_operand.vmem [shape: f32[1,256], index: 4, kind: input, shape index: {}]   ;;  %s4436_s5 = inlined_call_operand.vmem [shape: bf16[256,128], index: 5, kind: input, shape index: {}]   ;;  %s4437_s6 = inlined_call_operand.vmem [shape: f32[1,128], index: 6, kind: input, shape index: {}]   ;;  %s4438_s7 = inlined_call_operand.vmem [shape: bf16[128,64], index: 7, kind: input, shape index: {}]   ;;  %s4439_s8 = inlined_call_operand.vmem [shape: f32[1,64], index: 8, kind: input, shape index: {}]   ;;  %s4440_s9 = inlined_call_operand.vmem [shape: bf16[64,128], index: 9, kind: input, shape index: {}]   ;;  %s4441_s10 = inlined_call_operand.vmem [shape: f32[1,128], index: 10, kind: input, shape index: {}]   ;;  %s4442_s11 = inlined_call_operand.vmem [shape: bf16[8,512], index: 11, kind: input, shape index: {}]   ;;  %s4443_s12 = inlined_call_operand.vmem [shape: bf16[8,256], index: 12, kind: input, shape index: {}]   ;;  %s4444_s13 = inlined_call_operand.vmem [shape: bf16[8,128], index: 13, kind: input, shape index: {}]   ;;  %s4445_s14 = inlined_call_operand.vmem [shape: bf16[8,64], index: 14, kind: input, shape index: {}]   ;;  %s4446_s15 = inlined_call_operand.hbm [shape: f32[8,128], index: 15, kind: output, shape index: {}]  }
   0x1   :  { %v2008_v0 = vld [vmem:[%s4432_s1 + $0xe0] sm:$0xf]  ;;  %v2805_v1 = vld [vmem:[%s4432_s1 + $0xec] sm:$0xf0] }
   0x2   :  { %v2136_v2 = vld [vmem:[%s4432_s1 + $0x1e0] sm:$0xf]  ;;  %v2009_v3 = vor.u32 %v2805_v1, %v2008_v0  ;;  %v2837_v4 = vld [vmem:[%s4432_s1 + $0x1ec] sm:$0xf0] }
   0x3   :  { %v2264_v5 = vld [vmem:[%s4432_s1 + $0x2e0] sm:$0xf]  ;;  %v2869_v6 = vld [vmem:[%s4432_s1 + $0x2ec] sm:$0xf0]  ;;  %v2137_v7 = vor.u32 %v2837_v4, %v2136_v2 }
   0x4   :  { %v2265_v8 = vor.u32 %v2869_v6, %v2264_v5  ;;  %v2392_v9 = vld [vmem:[%s4432_s1 + $0x3e0] sm:$0xf]  ;;  %v2901_v10 = vld [vmem:[%s4432_s1 + $0x3ec] sm:$0xf0]  ;;  %846 = vmatpush.bf16.msra.mxu0 %v2009_v3 }
   0x5   :  { %v1992_v11 = vld [vmem:[%s4432_s1 + $0xc0] sm:$0xf]  ;;  %v2393_v12 = vor.u32 %v2901_v10, %v2392_v9  ;;  %v2801_v13 = vld [vmem:[%s4432_s1 + $0xcc] sm:$0xf0]  ;;  %859 = vmatpush.bf16.msra.mxu1 %v2137_v7 }
   0x6   :  { %v2120_v14 = vld [vmem:[%s4432_s1 + $0x1c0] sm:$0xf]  ;;  %v2833_v15 = vld [vmem:[%s4432_s1 + $0x1cc] sm:$0xf0]  ;;  %872 = vmatpush.bf16.msra.mxu2 %v2265_v8  ;;  %v1993_v16 = vor.u32 %v2801_v13, %v1992_v11 }
   0x7   :  { %v2121_v17 = vor.u32 %v2833_v15, %v2120_v14  ;;  %v2248_v18 = vld [vmem:[%s4432_s1 + $0x2c0] sm:$0xf]  ;;  %v2865_v19 = vld [vmem:[%s4432_s1 + $0x2cc] sm:$0xf0]  ;;  %885 = vmatpush.bf16.msra.mxu3 %v2393_v12 }
   0x8   :  { %v2376_v20 = vld [vmem:[%s4432_s1 + $0x3c0] sm:$0xf]  ;;  %v2249_v21 = vor.u32 %v2865_v19, %v2248_v18  ;;  %v2897_v22 = vld [vmem:[%s4432_s1 + $0x3cc] sm:$0xf0]  ;;  %847 = vmatpush.bf16.msra.mxu0 %v1993_v16 }
   0x9   :  { %v1976_v23 = vld [vmem:[%s4432_s1 + $0xa0] sm:$0xf]  ;;  %v2797_v24 = vld [vmem:[%s4432_s1 + $0xac] sm:$0xf0]  ;;  %v2377_v25 = vor.u32 %v2897_v22, %v2376_v20  ;;  %860 = vmatpush.bf16.msra.mxu1 %v2121_v17 }
   0xa   :  { %v2104_v26 = vld [vmem:[%s4432_s1 + $0x1a0] sm:$0xf]  ;;  %v2829_v27 = vld [vmem:[%s4432_s1 + $0x1ac] sm:$0xf0]  ;;  %v1977_v29 = vor.u32 %v2797_v24, %v1976_v23  ;;  %873 = vmatpush.bf16.msra.mxu2 %v2249_v21 }
   0xb   :  { %v2232_v28 = vld [vmem:[%s4432_s1 + $0x2a0] sm:$0xf]  ;;  %v2861_v30 = vld [vmem:[%s4432_s1 + $0x2ac] sm:$0xf0]  ;;  %v2105_v33 = vor.u32 %v2829_v27, %v2104_v26  ;;  %886 = vmatpush.bf16.msra.mxu3 %v2377_v25 }
   0xc   :  { %v2360_v31 = vld [vmem:[%s4432_s1 + $0x3a0] sm:$0xf]  ;;  %v2893_v32 = vld [vmem:[%s4432_s1 + $0x3ac] sm:$0xf0]  ;;  %v2233_v34 = vor.u32 %v2861_v30, %v2232_v28  ;;  %848 = vmatpush.bf16.msra.mxu0 %v1977_v29  ;;  %v2803_v28 = vld [vmem:[%s4432_s1 + $0xe4] sm:$0xf] }
   0xd   :  { %v1960_v35 = vld [vmem:[%s4432_s1 + $0x80] sm:$0xf]  ;;  %v2793_v36 = vld [vmem:[%s4432_s1 + $0x8c] sm:$0xf0]  ;;  %v2361_v38 = vor.u32 %v2893_v32, %v2360_v31  ;;  %861 = vmatpush.bf16.msra.mxu1 %v2105_v33  ;;  %v2010_v29 = vld [vmem:[%s4432_s1 + $0xf0] sm:$0xf0] }
   0xe   :  { %v2088_v37 = vld [vmem:[%s4432_s1 + $0x180] sm:$0xf]  ;;  %v2825_v39 = vld [vmem:[%s4432_s1 + $0x18c] sm:$0xf0]  ;;  %v1961_v44 = vor.u32 %v2793_v36, %v1960_v35  ;;  %874 = vmatpush.bf16.msra.mxu2 %v2233_v34  ;;  %v2835_v30 = vld [vmem:[%s4432_s1 + $0x1e4] sm:$0xf] }
   0xf   :  { %v2216_v40 = vld [vmem:[%s4432_s1 + $0x280] sm:$0xf]  ;;  %v2857_v41 = vld [vmem:[%s4432_s1 + $0x28c] sm:$0xf0]  ;;  %v2089_v45 = vor.u32 %v2825_v39, %v2088_v37  ;;  %887 = vmatpush.bf16.msra.mxu3 %v2361_v38  ;;  %v2138_v31 = vld [vmem:[%s4432_s1 + $0x1f0] sm:$0xf0] }
  0x10   :  { %v2344_v42 = vld [vmem:[%s4432_s1 + $0x380] sm:$0xf]  ;;  %v2889_v43 = vld [vmem:[%s4432_s1 + $0x38c] sm:$0xf0]  ;;  %v2217_v46 = vor.u32 %v2857_v41, %v2216_v40  ;;  %849 = vmatpush.bf16.msra.mxu0 %v1961_v44  ;;  %v53_v32 = vld [vmem:[%s4431_s0 + $0x8] sm:$0xff] }
  0x11   :  { %v1944_v47 = vld [vmem:[%s4432_s1 + $0x60] sm:$0xf]  ;;  %v2789_v48 = vld [vmem:[%s4432_s1 + $0x6c] sm:$0xf0]  ;;  %v2345_v50 = vor.u32 %v2889_v43, %v2344_v42  ;;  %862 = vmatpush.bf16.msra.mxu1 %v2089_v45  ;;  %v2867_v34 = vld [vmem:[%s4432_s1 + $0x2e4] sm:$0xf]  ;;  %v196_v36 = vunpack.c.l.b16 %v53_v32  ;;  %v197_v43 = vunpack.c.h.b16 %v53_v32  ;;  %v2013_v45 = vor.u32 %v2803_v28, %v2010_v29 }
  0x12   :  { %v2072_v49 = vld [vmem:[%s4432_s1 + $0x160] sm:$0xf]  ;;  %v2821_v51 = vld [vmem:[%s4432_s1 + $0x16c] sm:$0xf0]  ;;  %v1945_v56 = vor.u32 %v2789_v48, %v1944_v47  ;;  %875 = vmatpush.bf16.msra.mxu2 %v2217_v46  ;;  %v2266_v35 = vld [vmem:[%s4432_s1 + $0x2f0] sm:$0xf0]  ;;  %v2141_v47 = vor.u32 %v2835_v30, %v2138_v31 }
  0x13   :  { %v2200_v52 = vld [vmem:[%s4432_s1 + $0x260] sm:$0xf]  ;;  %v2853_v53 = vld [vmem:[%s4432_s1 + $0x26c] sm:$0xf0]  ;;  %v2073_v57 = vor.u32 %v2821_v51, %v2072_v49  ;;  %888 = vmatpush.bf16.msra.mxu3 %v2345_v50  ;;  %v2899_v40 = vld [vmem:[%s4432_s1 + $0x3e4] sm:$0xf]  ;;  %v2269_v48 = vor.u32 %v2867_v34, %v2266_v35 }
  0x14   :  { %v2328_v54 = vld [vmem:[%s4432_s1 + $0x360] sm:$0xf]  ;;  %v2885_v55 = vld [vmem:[%s4432_s1 + $0x36c] sm:$0xf0]  ;;  %v2201_v58 = vor.u32 %v2853_v53, %v2200_v52  ;;  %850 = vmatpush.bf16.msra.mxu0 %v1945_v56  ;;  %v2394_v41 = vld [vmem:[%s4432_s1 + $0x3f0] sm:$0xf0]  ;;  %v3362_v56 = vpack.c.b16 %v196_v36, %v196_v36 }
  0x15   :  { %v1928_v59 = vld [vmem:[%s4432_s1 + $0x40] sm:$0xf]  ;;  %v2785_v60 = vld [vmem:[%s4432_s1 + $0x4c] sm:$0xf0]  ;;  %v2329_v62 = vor.u32 %v2885_v55, %v2328_v54  ;;  %863 = vmatpush.bf16.msra.mxu1 %v2073_v57  ;;  %v2799_v49 = vld [vmem:[%s4432_s1 + $0xc4] sm:$0xf]  ;;  %v2397_v52 = vor.u32 %v2899_v40, %v2394_v41 }
  0x16   :  { %v2056_v61 = vld [vmem:[%s4432_s1 + $0x140] sm:$0xf]  ;;  %v2817_v63 = vld [vmem:[%s4432_s1 + $0x14c] sm:$0xf0]  ;;  %v1929_v4 = vor.u32 %v2785_v60, %v1928_v59  ;;  %876 = vmatpush.bf16.msra.mxu2 %v2201_v58  ;;  %v1994_v50 = vld [vmem:[%s4432_s1 + $0xd0] sm:$0xf0]  ;;  %v3372_v60 = vpack.c.b16 %v197_v43, %v197_v43 }
  0x17   :  { %v2184_v0 = vld [vmem:[%s4432_s1 + $0x240] sm:$0xf]  ;;  %v2849_v1 = vld [vmem:[%s4432_s1 + $0x24c] sm:$0xf0]  ;;  %v2057_v5 = vor.u32 %v2817_v63, %v2056_v61  ;;  %889 = vmatpush.bf16.msra.mxu3 %v2329_v62  ;;  %v2831_v51 = vld [vmem:[%s4432_s1 + $0x1c4] sm:$0xf]  ;;  %v1997_v61 = vor.u32 %v2799_v49, %v1994_v50 }
  0x18   :  { %v2312_v2 = vld [vmem:[%s4432_s1 + $0x340] sm:$0xf]  ;;  %v2881_v3 = vld [vmem:[%s4432_s1 + $0x34c] sm:$0xf0]  ;;  %v2185_v6 = vor.u32 %v2849_v1, %v2184_v0  ;;  %851 = vmatpush.bf16.msra.mxu0 %v1929_v4  ;;  %v2122_v53 = vld [vmem:[%s4432_s1 + $0x1d0] sm:$0xf0] }
  0x19   :  { %v1912_v7 = vld [vmem:[%s4432_s1 + $0x20] sm:$0xf]  ;;  %v2781_v8 = vld [vmem:[%s4432_s1 + $0x2c] sm:$0xf0]  ;;  %v2313_v10 = vor.u32 %v2881_v3, %v2312_v2  ;;  %864 = vmatpush.bf16.msra.mxu1 %v2057_v5  ;;  %v2863_v54 = vld [vmem:[%s4432_s1 + $0x2c4] sm:$0xf]  ;;  %v2125_v63 = vor.u32 %v2831_v51, %v2122_v53 }
  0x1a   :  { %v2040_v9 = vld [vmem:[%s4432_s1 + $0x120] sm:$0xf]  ;;  %v2813_v11 = vld [vmem:[%s4432_s1 + $0x12c] sm:$0xf0]  ;;  %v1913_v17 = vor.u32 %v2781_v8, %v1912_v7  ;;  %877 = vmatpush.bf16.msra.mxu2 %v2185_v6  ;;  %v2250_v55 = vld [vmem:[%s4432_s1 + $0x2d0] sm:$0xf0] }
  0x1b   :  { %v2168_v12 = vld [vmem:[%s4432_s1 + $0x220] sm:$0xf]  ;;  %v2845_v13 = vld [vmem:[%s4432_s1 + $0x22c] sm:$0xf0]  ;;  %v2041_v21 = vor.u32 %v2813_v11, %v2040_v9  ;;  %890 = vmatpush.bf16.msra.mxu3 %v2313_v10  ;;  %v2895_v57 = vld [vmem:[%s4432_s1 + $0x3c4] sm:$0xf]  ;;  %v2253_v0 = vor.u32 %v2863_v54, %v2250_v55 }
  0x1c   :  { %v2296_v14 = vld [vmem:[%s4432_s1 + $0x320] sm:$0xf]  ;;  %v2877_v15 = vld [vmem:[%s4432_s1 + $0x32c] sm:$0xf0]  ;;  %v2169_v22 = vor.u32 %v2845_v13, %v2168_v12  ;;  %852 = vmatpush.bf16.msra.mxu0 %v1913_v17  ;;  %v2378_v58 = vld [vmem:[%s4432_s1 + $0x3d0] sm:$0xf0] }
  0x1d   :  { %v1896_v16 = vld [vmem:[%s4432_s1] sm:$0xf]  ;;  %v2777_v18 = vld [vmem:[%s4432_s1 + $0xc] sm:$0xf0]  ;;  %v2297_v26 = vor.u32 %v2877_v15, %v2296_v14  ;;  %865 = vmatpush.bf16.msra.mxu1 %v2041_v21  ;;  %v2795_v1 = vld [vmem:[%s4432_s1 + $0xa4] sm:$0xf]  ;;  %v2381_v4 = vor.u32 %v2895_v57, %v2378_v58 }
  0x1e   :  { %v2024_v19 = vld [vmem:[%s4432_s1 + $0x100] sm:$0xf]  ;;  %v2809_v20 = vld [vmem:[%s4432_s1 + $0x10c] sm:$0xf0]  ;;  %v1897_v33 = vor.u32 %v2777_v18, %v1896_v16  ;;  %878 = vmatpush.bf16.msra.mxu2 %v2169_v22  ;;  %v1978_v2 = vld [vmem:[%s4432_s1 + $0xb0] sm:$0xf0] }
  0x1f   :  { %v2152_v23 = vld [vmem:[%s4432_s1 + $0x200] sm:$0xf]  ;;  %v2841_v24 = vld [vmem:[%s4432_s1 + $0x20c] sm:$0xf0]  ;;  %v2025_v38 = vor.u32 %v2809_v20, %v2024_v19  ;;  %891 = vmatpush.bf16.msra.mxu3 %v2297_v26  ;;  %v2827_v3 = vld [vmem:[%s4432_s1 + $0x1a4] sm:$0xf]  ;;  %v1981_v10 = vor.u32 %v2795_v1, %v1978_v2 }
  0x20   :  { %v2280_v25 = vld [vmem:[%s4432_s1 + $0x300] sm:$0xf]  ;;  %v2873_v27 = vld [vmem:[%s4432_s1 + $0x30c] sm:$0xf0]  ;;  %v2153_v39 = vor.u32 %v2841_v24, %v2152_v23  ;;  %853 = vmatpush.bf16.msra.mxu0 %v1897_v33  ;;  %v2106_v5 = vld [vmem:[%s4432_s1 + $0x1b0] sm:$0xf0] }
  0x21   :  { %v52_v37 = vld [vmem:[%s4431_s0] sm:$0xff]  ;;  %v2281_v44 = vor.u32 %v2873_v27, %v2280_v25  ;;  %866 = vmatpush.bf16.msra.mxu1 %v2025_v38  ;;  %v2234_v7 = vld [vmem:[%s4432_s1 + $0x2b0] sm:$0xf0]  ;;  %v2109_v11 = vor.u32 %v2827_v3, %v2106_v5 }
  0x22   :  { %v194_v42 = vunpack.c.l.b16 %v52_v37  ;;  %v195_v46 = vunpack.c.h.b16 %v52_v37  ;;  %879 = vmatpush.bf16.msra.mxu2 %v2153_v39  ;;  %v2859_v6 = vld [vmem:[%s4432_s1 + $0x2a4] sm:$0xf]  ;;  %v2362_v9 = vld [vmem:[%s4432_s1 + $0x3b0] sm:$0xf0] }
  0x23   :  { %892 = vmatpush.bf16.msra.mxu3 %v2281_v44  ;;  %v2891_v8 = vld [vmem:[%s4432_s1 + $0x3a4] sm:$0xf]  ;;  %v2237_v12 = vor.u32 %v2859_v6, %v2234_v7  ;;  %v1962_v14 = vld [vmem:[%s4432_s1 + $0x90] sm:$0xf0] }
  0x24   :  { %v3370_v59 = vpack.c.b16 %v194_v42, %v194_v42  ;;  %898 = vmatpush.bf16.msrb.mxu0 %v2013_v45  ;;  %v3374_v62 = vpack.c.b16 %v195_v46, %v195_v46  ;;  %v2791_v13 = vld [vmem:[%s4432_s1 + $0x84] sm:$0xf]  ;;  %v2365_v16 = vor.u32 %v2891_v8, %v2362_v9  ;;  %v2090_v17 = vld [vmem:[%s4432_s1 + $0x190] sm:$0xf0] }
  0x25   :  { %911 = vmatpush.bf16.msrb.mxu1 %v2141_v47  ;;  %880 = vmatmul.bf16.vlgmr.msra.gmra.mxu2 %v3362_v56  ;;  %v2823_v15 = vld [vmem:[%s4432_s1 + $0x184] sm:$0xf]  ;;  %v2218_v19 = vld [vmem:[%s4432_s1 + $0x290] sm:$0xf0]  ;;  %v1965_v22 = vor.u32 %v2791_v13, %v1962_v14  ;;  %v2838_v14 = vld [vmem:[%s4432_s1 + $0x1f4] sm:$0xf0] }
  0x26   :  { %924 = vmatpush.bf16.msrb.mxu2 %v2269_v48  ;;  %854 = vmatmul.bf16.vlgmr.msra.gmra.mxu0 %v3370_v59  ;;  %v2855_v18 = vld [vmem:[%s4432_s1 + $0x284] sm:$0xf]  ;;  %v2346_v21 = vld [vmem:[%s4432_s1 + $0x390] sm:$0xf0]  ;;  %v2093_v23 = vor.u32 %v2823_v15, %v2090_v17  ;;  %v2272_v15 = vld [vmem:[%s4432_s1 + $0x2e8] sm:$0xf] }
  0x27   :  { %937 = vmatpush.bf16.msrb.mxu3 %v2397_v52  ;;  %867 = vmatmul.bf16.vlgmr.msra.gmra.mxu1 %v3374_v62  ;;  %v2887_v20 = vld [vmem:[%s4432_s1 + $0x384] sm:$0xf]  ;;  %v2221_v24 = vor.u32 %v2855_v18, %v2218_v19  ;;  %v1946_v26 = vld [vmem:[%s4432_s1 + $0x70] sm:$0xf0]  ;;  %v2400_v19 = vld [vmem:[%s4432_s1 + $0x3e8] sm:$0xf] }
  0x28   :  { %893 = vmatmul.bf16.vlgmr.msra.gmra.mxu3 %v3372_v60  ;;  %899 = vmatpush.bf16.msrb.mxu0 %v1997_v61  ;;  %v2787_v25 = vld [vmem:[%s4432_s1 + $0x64] sm:$0xf]  ;;  %v2349_v28 = vor.u32 %v2887_v20, %v2346_v21  ;;  %v2074_v29 = vld [vmem:[%s4432_s1 + $0x170] sm:$0xf0]  ;;  %v2902_v20 = vld [vmem:[%s4432_s1 + $0x3f4] sm:$0xf0] }
  0x29   :  { %912 = vmatpush.bf16.msrb.mxu1 %v2125_v63  ;;  %v2819_v27 = vld [vmem:[%s4432_s1 + $0x164] sm:$0xf]  ;;  %v2202_v31 = vld [vmem:[%s4432_s1 + $0x270] sm:$0xf0]  ;;  %v1949_v34 = vor.u32 %v2787_v25, %v1946_v26  ;;  %v2000_v25 = vld [vmem:[%s4432_s1 + $0xc8] sm:$0xf] }
  0x2a   :  { %925 = vmatpush.bf16.msrb.mxu2 %v2253_v0  ;;  %v2851_v30 = vld [vmem:[%s4432_s1 + $0x264] sm:$0xf]  ;;  %v2330_v33 = vld [vmem:[%s4432_s1 + $0x370] sm:$0xf0]  ;;  %v2077_v35 = vor.u32 %v2819_v27, %v2074_v29  ;;  %v2802_v26 = vld [vmem:[%s4432_s1 + $0xd4] sm:$0xf0] }
  0x2b   :  { %938 = vmatpush.bf16.msrb.mxu3 %v2381_v4  ;;  %v2883_v32 = vld [vmem:[%s4432_s1 + $0x364] sm:$0xf]  ;;  %v2205_v36 = vor.u32 %v2851_v30, %v2202_v31  ;;  %v1930_v38 = vld [vmem:[%s4432_s1 + $0x50] sm:$0xf0]  ;;  %v2128_v27 = vld [vmem:[%s4432_s1 + $0x1c8] sm:$0xf] }
  0x2c   :  { %900 = vmatpush.bf16.msrb.mxu0 %v1981_v10  ;;  %v2783_v37 = vld [vmem:[%s4432_s1 + $0x44] sm:$0xf]  ;;  %v2333_v40 = vor.u32 %v2883_v32, %v2330_v33  ;;  %v2058_v41 = vld [vmem:[%s4432_s1 + $0x150] sm:$0xf0]  ;;  %v2016_v10 = vld [vmem:[%s4432_s1 + $0xe8] sm:$0xf] }
  0x2d   :  { %913 = vmatpush.bf16.msrb.mxu1 %v2109_v11  ;;  %v2815_v39 = vld [vmem:[%s4432_s1 + $0x144] sm:$0xf]  ;;  %v2186_v43 = vld [vmem:[%s4432_s1 + $0x250] sm:$0xf0]  ;;  %v1933_v46 = vor.u32 %v2783_v37, %v1930_v38  ;;  %v2806_v11 = vld [vmem:[%s4432_s1 + $0xf4] sm:$0xf0] }
  0x2e   :  { %926 = vmatpush.bf16.msrb.mxu2 %v2237_v12  ;;  %v2847_v42 = vld [vmem:[%s4432_s1 + $0x244] sm:$0xf]  ;;  %v2314_v45 = vld [vmem:[%s4432_s1 + $0x350] sm:$0xf0]  ;;  %v2061_v47 = vor.u32 %v2815_v39, %v2058_v41  ;;  %v2144_v12 = vld [vmem:[%s4432_s1 + $0x1e8] sm:$0xf] }
  0x2f   :  { %939 = vmatpush.bf16.msrb.mxu3 %v2365_v16  ;;  %v2879_v44 = vld [vmem:[%s4432_s1 + $0x344] sm:$0xf]  ;;  %v2189_v48 = vor.u32 %v2847_v42, %v2186_v43  ;;  %v1914_v50 = vld [vmem:[%s4432_s1 + $0x30] sm:$0xf0]  ;;  %v2870_v16 = vld [vmem:[%s4432_s1 + $0x2f4] sm:$0xf0] }
  0x30   :  { %901 = vmatpush.bf16.msrb.mxu0 %v1965_v22  ;;  %v2779_v49 = vld [vmem:[%s4432_s1 + $0x24] sm:$0xf]  ;;  %v2317_v52 = vor.u32 %v2879_v44, %v2314_v45  ;;  %v2042_v53 = vld [vmem:[%s4432_s1 + $0x130] sm:$0xf0]  ;;  %v2017_v22 = vor.u32 %v2806_v11, %v2016_v10  ;;  %v2834_v29 = vld [vmem:[%s4432_s1 + $0x1d4] sm:$0xf0] }
  0x31   :  { %914 = vmatpush.bf16.msrb.mxu1 %v2093_v23  ;;  %v2811_v51 = vld [vmem:[%s4432_s1 + $0x124] sm:$0xf]  ;;  %v2170_v55 = vld [vmem:[%s4432_s1 + $0x230] sm:$0xf0]  ;;  %v1917_v61 = vor.u32 %v2779_v49, %v1914_v50  ;;  %v2145_v23 = vor.u32 %v2838_v14, %v2144_v12  ;;  %v2256_v30 = vld [vmem:[%s4432_s1 + $0x2c8] sm:$0xf] }
  0x32   :  { %927 = vmatpush.bf16.msrb.mxu2 %v2221_v24  ;;  %v2843_v54 = vld [vmem:[%s4432_s1 + $0x224] sm:$0xf]  ;;  %v2298_v58 = vld [vmem:[%s4432_s1 + $0x330] sm:$0xf0]  ;;  %v2045_v1 = vor.u32 %v2811_v51, %v2042_v53  ;;  %v2273_v24 = vor.u32 %v2870_v16, %v2272_v15  ;;  %v2866_v31 = vld [vmem:[%s4432_s1 + $0x2d4] sm:$0xf0] }
  0x33   :  { %940 = vmatpush.bf16.msrb.mxu3 %v2349_v28  ;;  %v2875_v57 = vld [vmem:[%s4432_s1 + $0x324] sm:$0xf]  ;;  %v1898_v0 = vld [vmem:[%s4432_s1 + $0x10] sm:$0xf0]  ;;  %v2173_v2 = vor.u32 %v2843_v54, %v2170_v55  ;;  %v2401_v28 = vor.u32 %v2902_v20, %v2400_v19  ;;  %v2384_v32 = vld [vmem:[%s4432_s1 + $0x3c8] sm:$0xf] }
  0x34   :  { %902 = vmatpush.bf16.msrb.mxu0 %v1949_v34  ;;  %v2775_v63 = vld [vmem:[%s4432_s1 + $0x4] sm:$0xf]  ;;  %v2026_v4 = vld [vmem:[%s4432_s1 + $0x110] sm:$0xf0]  ;;  %v2301_v6 = vor.u32 %v2875_v57, %v2298_v58  ;;  %v2898_v33 = vld [vmem:[%s4432_s1 + $0x3d4] sm:$0xf0]  ;;  %v2001_v34 = vor.u32 %v2802_v26, %v2000_v25 }
  0x35   :  { %915 = vmatpush.bf16.msrb.mxu1 %v2077_v35  ;;  %v2807_v3 = vld [vmem:[%s4432_s1 + $0x104] sm:$0xf]  ;;  %v2154_v7 = vld [vmem:[%s4432_s1 + $0x210] sm:$0xf0]  ;;  %v1901_v13 = vor.u32 %v2775_v63, %v1898_v0  ;;  %v2129_v35 = vor.u32 %v2834_v29, %v2128_v27  ;;  %v1984_v37 = vld [vmem:[%s4432_s1 + $0xa8] sm:$0xf] }
  0x36   :  { %928 = vmatpush.bf16.msrb.mxu2 %v2205_v36  ;;  %v2839_v5 = vld [vmem:[%s4432_s1 + $0x204] sm:$0xf]  ;;  %v2282_v9 = vld [vmem:[%s4432_s1 + $0x310] sm:$0xf0]  ;;  %v2029_v17 = vor.u32 %v2807_v3, %v2026_v4  ;;  %v2257_v36 = vor.u32 %v2866_v31, %v2256_v30  ;;  %v2798_v38 = vld [vmem:[%s4432_s1 + $0xb4] sm:$0xf0] }
  0x37   :  { %941 = vmatpush.bf16.msrb.mxu3 %v2333_v40  ;;  %v2871_v8 = vld [vmem:[%s4432_s1 + $0x304] sm:$0xf]  ;;  %v2157_v18 = vor.u32 %v2839_v5, %v2154_v7  ;;  %v2112_v39 = vld [vmem:[%s4432_s1 + $0x1a8] sm:$0xf]  ;;  %v2385_v40 = vor.u32 %v2898_v33, %v2384_v32  ;;  %v2830_v41 = vld [vmem:[%s4432_s1 + $0x1b4] sm:$0xf0] }
  0x38   :  { %903 = vmatpush.bf16.msrb.mxu0 %v1933_v46  ;;  %v2285_v21 = vor.u32 %v2871_v8, %v2282_v9  ;;  %v2240_v42 = vld [vmem:[%s4432_s1 + $0x2a8] sm:$0xf]  ;;  %v2862_v43 = vld [vmem:[%s4432_s1 + $0x2b4] sm:$0xf0]  ;;  %v1985_v46 = vor.u32 %v2798_v38, %v1984_v37 }
  0x39   :  { %916 = vmatpush.bf16.msrb.mxu1 %v2061_v47  ;;  %v2368_v44 = vld [vmem:[%s4432_s1 + $0x3a8] sm:$0xf]  ;;  %v2894_v45 = vld [vmem:[%s4432_s1 + $0x3b4] sm:$0xf0]  ;;  %v2113_v47 = vor.u32 %v2830_v41, %v2112_v39 }
  0x3a   :  { %929 = vmatpush.bf16.msrb.mxu2 %v2189_v48  ;;  %v2241_v48 = vor.u32 %v2862_v43, %v2240_v42  ;;  %v1968_v49 = vld [vmem:[%s4432_s1 + $0x88] sm:$0xf]  ;;  %v2794_v50 = vld [vmem:[%s4432_s1 + $0x94] sm:$0xf0] }
  0x3b   :  { %942 = vmatpush.bf16.msrb.mxu3 %v2317_v52  ;;  %v2096_v51 = vld [vmem:[%s4432_s1 + $0x188] sm:$0xf]  ;;  %v2369_v52 = vor.u32 %v2894_v45, %v2368_v44  ;;  %v2826_v53 = vld [vmem:[%s4432_s1 + $0x194] sm:$0xf0] }
  0x3c   :  { %904 = vmatpush.bf16.msrb.mxu0 %v1917_v61  ;;  %v2224_v54 = vld [vmem:[%s4432_s1 + $0x288] sm:$0xf]  ;;  %v2858_v55 = vld [vmem:[%s4432_s1 + $0x294] sm:$0xf0]  ;;  %v1969_v61 = vor.u32 %v2794_v50, %v1968_v49  ;;  %v2097_v63 = vor.u32 %v2826_v53, %v2096_v51 }
  0x3d   :  { %917 = vmatpush.bf16.msrb.mxu1 %v2045_v1  ;;  %v2352_v57 = vld [vmem:[%s4432_s1 + $0x388] sm:$0xf]  ;;  %v2890_v58 = vld [vmem:[%s4432_s1 + $0x394] sm:$0xf0]  ;;  %v2225_v0 = vor.u32 %v2858_v55, %v2224_v54 }
  0x3e   :  { %930 = vmatpush.bf16.msrb.mxu2 %v2173_v2  ;;  %v1952_v1 = vld [vmem:[%s4432_s1 + $0x68] sm:$0xf]  ;;  %v2790_v2 = vld [vmem:[%s4432_s1 + $0x74] sm:$0xf0]  ;;  %v2353_v4 = vor.u32 %v2890_v58, %v2352_v57 }
  0x3f   :  { %943 = vmatpush.bf16.msrb.mxu3 %v2301_v6  ;;  %v2080_v3 = vld [vmem:[%s4432_s1 + $0x168] sm:$0xf]  ;;  %v2822_v5 = vld [vmem:[%s4432_s1 + $0x174] sm:$0xf0]  ;;  %v1953_v10 = vor.u32 %v2790_v2, %v1952_v1 }
  0x40   :  { %905 = vmatpush.bf16.msrb.mxu0 %v1901_v13  ;;  %v2208_v6 = vld [vmem:[%s4432_s1 + $0x268] sm:$0xf]  ;;  %v2854_v7 = vld [vmem:[%s4432_s1 + $0x274] sm:$0xf0]  ;;  %v2081_v13 = vor.u32 %v2822_v5, %v2080_v3 }
  0x41   :  { %918 = vmatpush.bf16.msrb.mxu1 %v2029_v17  ;;  %v2336_v8 = vld [vmem:[%s4432_s1 + $0x368] sm:$0xf]  ;;  %v2886_v9 = vld [vmem:[%s4432_s1 + $0x374] sm:$0xf0]  ;;  %v2209_v14 = vor.u32 %v2854_v7, %v2208_v6 }
  0x42   :  { %931 = vmatpush.bf16.msrb.mxu2 %v2157_v18  ;;  %v1936_v11 = vld [vmem:[%s4432_s1 + $0x48] sm:$0xf]  ;;  %v2786_v12 = vld [vmem:[%s4432_s1 + $0x54] sm:$0xf0]  ;;  %v2337_v18 = vor.u32 %v2886_v9, %v2336_v8 }
  0x43   :  { %944 = vmatpush.bf16.msrb.mxu3 %v2285_v21  ;;  %906 = vmatmul.bf16.vlgmr.msrb.gmra.mxu0 %v3370_v59  ;;  %v2064_v15 = vld [vmem:[%s4432_s1 + $0x148] sm:$0xf]  ;;  %v2818_v16 = vld [vmem:[%s4432_s1 + $0x154] sm:$0xf0] }
  0x44   :  { %950 = vmatpush.bf16.msra.mxu0 %v2017_v22  ;;  %919 = vmatmul.bf16.vlgmr.msrb.gmra.mxu1 %v3374_v62  ;;  %v2192_v17 = vld [vmem:[%s4432_s1 + $0x248] sm:$0xf]  ;;  %v2850_v19 = vld [vmem:[%s4432_s1 + $0x254] sm:$0xf0]  ;;  %v1937_v22 = vor.u32 %v2786_v12, %v1936_v11 }
  0x45   :  { %963 = vmatpush.bf16.msra.mxu1 %v2145_v23  ;;  %932 = vmatmul.bf16.vlgmr.msrb.gmra.mxu2 %v3362_v56  ;;  %v2320_v20 = vld [vmem:[%s4432_s1 + $0x348] sm:$0xf]  ;;  %v2882_v21 = vld [vmem:[%s4432_s1 + $0x354] sm:$0xf0] }
  0x46   :  { %976 = vmatpush.bf16.msra.mxu2 %v2273_v24  ;;  %945 = vmatmul.bf16.vlgmr.msrb.gmra.mxu3 %v3372_v60 }
  0x47   :  { %989 = vmatpush.bf16.msra.mxu3 %v2401_v28 }
  0x48   :  { %951 = vmatpush.bf16.msra.mxu0 %v2001_v34 }
  0x49   :  { %964 = vmatpush.bf16.msra.mxu1 %v2129_v35 }
  0x4a   :  { %977 = vmatpush.bf16.msra.mxu2 %v2257_v36 }
  0x4b   :  { %990 = vmatpush.bf16.msra.mxu3 %v2385_v40 }
  0x4c   :  { %952 = vmatpush.bf16.msra.mxu0 %v1985_v46 }
  0x4d   :  { %965 = vmatpush.bf16.msra.mxu1 %v2113_v47 }
  0x4e   :  { %978 = vmatpush.bf16.msra.mxu2 %v2241_v48 }
  0x4f   :  { %991 = vmatpush.bf16.msra.mxu3 %v2369_v52 }
  0x50   :  { %953 = vmatpush.bf16.msra.mxu0 %v1969_v61 }
  0x51   :  { %966 = vmatpush.bf16.msra.mxu1 %v2097_v63 }
  0x52   :  { %979 = vmatpush.bf16.msra.mxu2 %v2225_v0 }
  0x53   :  { %992 = vmatpush.bf16.msra.mxu3 %v2353_v4 }
  0x54   :  { %954 = vmatpush.bf16.msra.mxu0 %v1953_v10 }
  0x55   :  { %20 = vsyncpa [#allocation3], 0  ;;  %967 = vmatpush.bf16.msra.mxu1 %v2081_v13  ;;  %v2065_v23 = vor.u32 %v2818_v16, %v2064_v15  ;;  %v2193_v24 = vor.u32 %v2850_v19, %v2192_v17  ;;  %v1920_v25 = vld [vmem:[%s4432_s1 + $0x28] sm:$0xf]  ;;  %v2782_v26 = vld [vmem:[%s4432_s1 + $0x34] sm:$0xf0]  ;;  %v2321_v28 = vor.u32 %v2882_v21, %v2320_v20 }
  0x56   :  { %980 = vmatpush.bf16.msra.mxu2 %v2209_v14  ;;  %v2048_v27 = vld [vmem:[%s4432_s1 + $0x128] sm:$0xf]  ;;  %v2814_v29 = vld [vmem:[%s4432_s1 + $0x134] sm:$0xf0]  ;;  %v1921_v34 = vor.u32 %v2782_v26, %v1920_v25  ;;  %v2804_v46 = vld [vmem:[%s4432_s1 + $0xec] sm:$0xf] }
  0x57   :  { %993 = vmatpush.bf16.msra.mxu3 %v2337_v18  ;;  %v2176_v30 = vld [vmem:[%s4432_s1 + $0x228] sm:$0xf]  ;;  %v2846_v31 = vld [vmem:[%s4432_s1 + $0x234] sm:$0xf0]  ;;  %v2049_v37 = vor.u32 %v2814_v29, %v2048_v27  ;;  %v2018_v47 = vld [vmem:[%s4432_s1 + $0xf8] sm:$0xf0] }
  0x58   :  { %v2304_v32 = vld [vmem:[%s4432_s1 + $0x328] sm:$0xf]  ;;  %v2878_v33 = vld [vmem:[%s4432_s1 + $0x334] sm:$0xf0]  ;;  %955 = vmatpush.bf16.msra.mxu0 %v1937_v22  ;;  %v2177_v38 = vor.u32 %v2846_v31, %v2176_v30  ;;  %v2836_v48 = vld [vmem:[%s4432_s1 + $0x1ec] sm:$0xf]  ;;  %v2021_v61 = vor.u32 %v2804_v46, %v2018_v47 }
  0x59   :  { %v1904_v35 = vld [vmem:[%s4432_s1 + $0x8] sm:$0xf]  ;;  %v2778_v36 = vld [vmem:[%s4432_s1 + $0x14] sm:$0xf0]  ;;  %968 = vmatpush.bf16.msra.mxu1 %v2065_v23  ;;  %v2305_v42 = vor.u32 %v2878_v33, %v2304_v32  ;;  %v2146_v50 = vld [vmem:[%s4432_s1 + $0x1f8] sm:$0xf0] }
  0x5a   :  { %981 = vmatpush.bf16.msra.mxu2 %v2193_v24  ;;  %v2032_v39 = vld [vmem:[%s4432_s1 + $0x108] sm:$0xf]  ;;  %v2810_v40 = vld [vmem:[%s4432_s1 + $0x114] sm:$0xf0]  ;;  %v1905_v49 = vor.u32 %v2778_v36, %v1904_v35  ;;  %v2868_v51 = vld [vmem:[%s4432_s1 + $0x2ec] sm:$0xf]  ;;  %v2149_v63 = vor.u32 %v2836_v48, %v2146_v50 }
  0x5b   :  { %v2160_v41 = vld [vmem:[%s4432_s1 + $0x208] sm:$0xf]  ;;  %994 = vmatpush.bf16.msra.mxu3 %v2321_v28  ;;  %v2842_v43 = vld [vmem:[%s4432_s1 + $0x214] sm:$0xf0]  ;;  %v2274_v52 = vld [vmem:[%s4432_s1 + $0x2f8] sm:$0xf0]  ;;  %v2033_v53 = vor.u32 %v2810_v40, %v2032_v39 }
  0x5c   :  { %v2288_v44 = vld [vmem:[%s4432_s1 + $0x308] sm:$0xf]  ;;  %v2874_v45 = vld [vmem:[%s4432_s1 + $0x314] sm:$0xf0]  ;;  %956 = vmatpush.bf16.msra.mxu0 %v1921_v34  ;;  %v2161_v54 = vor.u32 %v2842_v43, %v2160_v41  ;;  %v2900_v55 = vld [vmem:[%s4432_s1 + $0x3ec] sm:$0xf]  ;;  %v2277_v0 = vor.u32 %v2868_v51, %v2274_v52 }
  0x5d   :  { %969 = vmatpush.bf16.msra.mxu1 %v2049_v37  ;;  %v2402_v57 = vld [vmem:[%s4432_s1 + $0x3f8] sm:$0xf0]  ;;  %v2289_v58 = vor.u32 %v2874_v45, %v2288_v44  ;;  %v2800_v1 = vld [vmem:[%s4432_s1 + $0xcc] sm:$0xf]  ;;  %vm1860_vm0 = vcmask 523264   ;;  %s1885_s28 = sshll.u32 %s4446_s15, 4  ;;  %s1886_s28 = int_to_ptr.hbm [resolvable:$true] %s1885_s28 }
  0x5e   :  { %982 = vmatpush.bf16.msra.mxu2 %v2177_v38  ;;  %v2002_v2 = vld [vmem:[%s4432_s1 + $0xd8] sm:$0xf0]  ;;  %v2832_v3 = vld [vmem:[%s4432_s1 + $0x1cc] sm:$0xf]  ;;  %v2405_v4 = vor.u32 %v2900_v55, %v2402_v57 }
  0x5f   :  { %995 = vmatpush.bf16.msra.mxu3 %v2305_v42  ;;  %v2130_v5 = vld [vmem:[%s4432_s1 + $0x1d8] sm:$0xf0]  ;;  %v2864_v6 = vld [vmem:[%s4432_s1 + $0x2cc] sm:$0xf]  ;;  %v2005_v10 = vor.u32 %v2800_v1, %v2002_v2 }
  0x60   :  { %957 = vmatpush.bf16.msra.mxu0 %v1905_v49  ;;  %v2258_v7 = vld [vmem:[%s4432_s1 + $0x2d8] sm:$0xf0]  ;;  %v2896_v8 = vld [vmem:[%s4432_s1 + $0x3cc] sm:$0xf]  ;;  %v2133_v11 = vor.u32 %v2832_v3, %v2130_v5 }
  0x61   :  { %970 = vmatpush.bf16.msra.mxu1 %v2033_v53  ;;  %v2386_v9 = vld [vmem:[%s4432_s1 + $0x3d8] sm:$0xf0]  ;;  %v2261_v12 = vor.u32 %v2864_v6, %v2258_v7  ;;  %v2796_v13 = vld [vmem:[%s4432_s1 + $0xac] sm:$0xf] }
  0x62   :  { %983 = vmatpush.bf16.msra.mxu2 %v2161_v54  ;;  %v1986_v14 = vld [vmem:[%s4432_s1 + $0xb8] sm:$0xf0]  ;;  %v2828_v15 = vld [vmem:[%s4432_s1 + $0x1ac] sm:$0xf]  ;;  %v2389_v16 = vor.u32 %v2896_v8, %v2386_v9 }
  0x63   :  { %996 = vmatpush.bf16.msra.mxu3 %v2289_v58  ;;  %v2114_v17 = vld [vmem:[%s4432_s1 + $0x1b8] sm:$0xf0]  ;;  %v2860_v18 = vld [vmem:[%s4432_s1 + $0x2ac] sm:$0xf]  ;;  %958 = vmatmul.bf16.vlgmr.msra.gmra.mxu0 %v3370_v59  ;;  %v1989_v22 = vor.u32 %v2796_v13, %v1986_v14 }
  0x64   :  { %1002 = vmatpush.bf16.msrb.mxu0 %v2021_v61  ;;  %v2242_v19 = vld [vmem:[%s4432_s1 + $0x2b8] sm:$0xf0]  ;;  %v2892_v20 = vld [vmem:[%s4432_s1 + $0x3ac] sm:$0xf]  ;;  %971 = vmatmul.bf16.vlgmr.msra.gmra.mxu1 %v3374_v62  ;;  %v2117_v23 = vor.u32 %v2828_v15, %v2114_v17 }
  0x65   :  { %1015 = vmatpush.bf16.msrb.mxu1 %v2149_v63  ;;  %984 = vmatmul.bf16.vlgmr.msra.gmra.mxu2 %v3362_v56  ;;  %v2370_v21 = vld [vmem:[%s4432_s1 + $0x3b8] sm:$0xf0]  ;;  %v2245_v24 = vor.u32 %v2860_v18, %v2242_v19  ;;  %v2792_v25 = vld [vmem:[%s4432_s1 + $0x8c] sm:$0xf] }
  0x66   :  { %1028 = vmatpush.bf16.msrb.mxu2 %v2277_v0  ;;  %997 = vmatmul.bf16.vlgmr.msra.gmra.mxu3 %v3372_v60  ;;  %v1970_v26 = vld [vmem:[%s4432_s1 + $0x98] sm:$0xf0]  ;;  %v2824_v27 = vld [vmem:[%s4432_s1 + $0x18c] sm:$0xf]  ;;  %v2373_v28 = vor.u32 %v2892_v20, %v2370_v21 }
  0x67   :  { %1041 = vmatpush.bf16.msrb.mxu3 %v2405_v4  ;;  %v2098_v29 = vld [vmem:[%s4432_s1 + $0x198] sm:$0xf0]  ;;  %v2856_v30 = vld [vmem:[%s4432_s1 + $0x28c] sm:$0xf]  ;;  %v1973_v34 = vor.u32 %v2792_v25, %v1970_v26 }
  0x68   :  { %1003 = vmatpush.bf16.msrb.mxu0 %v2005_v10  ;;  %v2226_v31 = vld [vmem:[%s4432_s1 + $0x298] sm:$0xf0]  ;;  %v2888_v32 = vld [vmem:[%s4432_s1 + $0x38c] sm:$0xf]  ;;  %v2101_v35 = vor.u32 %v2824_v27, %v2098_v29  ;;  %v2456_v29 = vld [vmem:[%s4434_s3 + $0x60] sm:$0xf] }
  0x69   :  { %1016 = vmatpush.bf16.msrb.mxu1 %v2133_v11  ;;  %v2354_v33 = vld [vmem:[%s4432_s1 + $0x398] sm:$0xf0]  ;;  %v2229_v36 = vor.u32 %v2856_v30, %v2226_v31  ;;  %v2788_v37 = vld [vmem:[%s4432_s1 + $0x6c] sm:$0xf]  ;;  %v2916_v30 = vld [vmem:[%s4434_s3 + $0x64] sm:$0xf0] }
  0x6a   :  { %1029 = vmatpush.bf16.msrb.mxu2 %v2261_v12  ;;  %v1954_v38 = vld [vmem:[%s4432_s1 + $0x78] sm:$0xf0]  ;;  %v2820_v39 = vld [vmem:[%s4432_s1 + $0x16c] sm:$0xf]  ;;  %v2357_v40 = vor.u32 %v2888_v32, %v2354_v33  ;;  %v2457_v31 = vor.u32 %v2916_v30, %v2456_v29  ;;  %v2448_v32 = vld [vmem:[%s4434_s3 + $0x50] sm:$0xf] }
  0x6b   :  { %1042 = vmatpush.bf16.msrb.mxu3 %v2389_v16  ;;  %v2082_v41 = vld [vmem:[%s4432_s1 + $0x178] sm:$0xf0]  ;;  %v2852_v42 = vld [vmem:[%s4432_s1 + $0x26c] sm:$0xf]  ;;  %v1957_v46 = vor.u32 %v2788_v37, %v1954_v38  ;;  %v2914_v33 = vld [vmem:[%s4434_s3 + $0x54] sm:$0xf0] }
  0x6c   :  { %1004 = vmatpush.bf16.msrb.mxu0 %v1989_v22  ;;  %v2210_v43 = vld [vmem:[%s4432_s1 + $0x278] sm:$0xf0]  ;;  %v2884_v44 = vld [vmem:[%s4432_s1 + $0x36c] sm:$0xf]  ;;  %v2085_v47 = vor.u32 %v2820_v39, %v2082_v41  ;;  %v2464_v22 = vld [vmem:[%s4434_s3 + $0x70] sm:$0xf] }
  0x6d   :  { %1017 = vmatpush.bf16.msrb.mxu1 %v2117_v23  ;;  %v2338_v45 = vld [vmem:[%s4432_s1 + $0x378] sm:$0xf0]  ;;  %v2213_v48 = vor.u32 %v2852_v42, %v2210_v43  ;;  %v2784_v49 = vld [vmem:[%s4432_s1 + $0x4c] sm:$0xf]  ;;  %v2918_v23 = vld [vmem:[%s4434_s3 + $0x74] sm:$0xf0] }
  0x6e   :  { %1030 = vmatpush.bf16.msrb.mxu2 %v2245_v24  ;;  %v1938_v50 = vld [vmem:[%s4432_s1 + $0x58] sm:$0xf0]  ;;  %v2816_v51 = vld [vmem:[%s4432_s1 + $0x14c] sm:$0xf]  ;;  %v2341_v52 = vor.u32 %v2884_v44, %v2338_v45  ;;  %v2934_v37 = vld [vmem:[%s4434_s3 + $0xf4] sm:$0xf0] }
  0x6f   :  { %1043 = vmatpush.bf16.msrb.mxu3 %v2373_v28  ;;  %v2066_v53 = vld [vmem:[%s4432_s1 + $0x158] sm:$0xf0]  ;;  %v2848_v54 = vld [vmem:[%s4432_s1 + $0x24c] sm:$0xf]  ;;  %v1941_v61 = vor.u32 %v2784_v49, %v1938_v50  ;;  %v2465_v28 = vor.u32 %v2918_v23, %v2464_v22  ;;  %v2908_v41 = vld [vmem:[%s4434_s3 + $0x24] sm:$0xf0] }
  0x70   :  { %1005 = vmatpush.bf16.msrb.mxu0 %v1973_v34  ;;  %v2194_v55 = vld [vmem:[%s4432_s1 + $0x258] sm:$0xf0]  ;;  %v2880_v57 = vld [vmem:[%s4432_s1 + $0x34c] sm:$0xf]  ;;  %v2069_v63 = vor.u32 %v2816_v51, %v2066_v53  ;;  %v2449_v34 = vor.u32 %v2914_v33, %v2448_v32  ;;  %v2416_v43 = vld [vmem:[%s4434_s3 + $0x10] sm:$0xf] }
  0x71   :  { %1018 = vmatpush.bf16.msrb.mxu1 %v2101_v35  ;;  %v2322_v58 = vld [vmem:[%s4432_s1 + $0x358] sm:$0xf0]  ;;  %v2197_v0 = vor.u32 %v2848_v54, %v2194_v55  ;;  %v2780_v1 = vld [vmem:[%s4432_s1 + $0x2c] sm:$0xf]  ;;  %v2912_v35 = vld [vmem:[%s4434_s3 + $0x44] sm:$0xf0] }
  0x72   :  { %1031 = vmatpush.bf16.msrb.mxu2 %v2229_v36  ;;  %v1922_v2 = vld [vmem:[%s4432_s1 + $0x38] sm:$0xf0]  ;;  %v2812_v3 = vld [vmem:[%s4432_s1 + $0x12c] sm:$0xf]  ;;  %v2325_v4 = vor.u32 %v2880_v57, %v2322_v58  ;;  %v2520_v44 = vld [vmem:[%s4434_s3 + $0xe0] sm:$0xf] }
  0x73   :  { %1044 = vmatpush.bf16.msrb.mxu3 %v2357_v40  ;;  %v2050_v5 = vld [vmem:[%s4432_s1 + $0x138] sm:$0xf0]  ;;  %v2844_v6 = vld [vmem:[%s4432_s1 + $0x22c] sm:$0xf]  ;;  %v1925_v10 = vor.u32 %v2780_v1, %v1922_v2  ;;  %v2424_v40 = vld [vmem:[%s4434_s3 + $0x20] sm:$0xf] }
  0x74   :  { %1006 = vmatpush.bf16.msrb.mxu0 %v1957_v46  ;;  %v2178_v7 = vld [vmem:[%s4432_s1 + $0x238] sm:$0xf0]  ;;  %v2876_v8 = vld [vmem:[%s4432_s1 + $0x32c] sm:$0xf]  ;;  %v2053_v12 = vor.u32 %v2812_v3, %v2050_v5  ;;  %v2425_v42 = vor.u32 %v2908_v41, %v2424_v40  ;;  %v2932_v45 = vld [vmem:[%s4434_s3 + $0xe4] sm:$0xf0] }
  0x75   :  { %1019 = vmatpush.bf16.msrb.mxu1 %v2085_v47  ;;  %v2306_v9 = vld [vmem:[%s4432_s1 + $0x338] sm:$0xf0]  ;;  %v2776_v11 = vld [vmem:[%s4432_s1 + $0xc] sm:$0xf]  ;;  %v2181_v13 = vor.u32 %v2844_v6, %v2178_v7  ;;  %v2906_v46 = vld [vmem:[%s4434_s3 + $0x14] sm:$0xf0]  ;;  %v2521_v47 = vor.u32 %v2932_v45, %v2520_v44 }
  0x76   :  { %1032 = vmatpush.bf16.msrb.mxu2 %v2213_v48  ;;  %v1906_v14 = vld [vmem:[%s4432_s1 + $0x18] sm:$0xf0]  ;;  %v2808_v15 = vld [vmem:[%s4432_s1 + $0x10c] sm:$0xf]  ;;  %v2309_v17 = vor.u32 %v2876_v8, %v2306_v9  ;;  %v2512_v48 = vld [vmem:[%s4434_s3 + $0xd0] sm:$0xf]  ;;  %v2417_v51 = vor.u32 %v2906_v46, %v2416_v43 }
  0x77   :  { %1045 = vmatpush.bf16.msrb.mxu3 %v2341_v52  ;;  %v2034_v16 = vld [vmem:[%s4432_s1 + $0x118] sm:$0xf0]  ;;  %v2840_v18 = vld [vmem:[%s4432_s1 + $0x20c] sm:$0xf]  ;;  %v1909_v24 = vor.u32 %v2776_v11, %v1906_v14  ;;  %v2930_v49 = vld [vmem:[%s4434_s3 + $0xd4] sm:$0xf0] }
  0x78   :  { %1007 = vmatpush.bf16.msrb.mxu0 %v1941_v61  ;;  %v2162_v19 = vld [vmem:[%s4432_s1 + $0x218] sm:$0xf0]  ;;  %v2872_v20 = vld [vmem:[%s4432_s1 + $0x30c] sm:$0xf]  ;;  %v2037_v25 = vor.u32 %v2808_v15, %v2034_v16  ;;  %v2513_v50 = vor.u32 %v2930_v49, %v2512_v48  ;;  %v2504_v52 = vld [vmem:[%s4434_s3 + $0xc0] sm:$0xf] }
  0x79   :  { %1020 = vmatpush.bf16.msrb.mxu1 %v2069_v63  ;;  %v2290_v21 = vld [vmem:[%s4432_s1 + $0x318] sm:$0xf0]  ;;  %v2165_v26 = vor.u32 %v2840_v18, %v2162_v19  ;;  %v2928_v53 = vld [vmem:[%s4434_s3 + $0xc4] sm:$0xf0]  ;;  %v2408_v54 = vld [vmem:[%s4434_s3] sm:$0xf] }
  0x7a   :  { %1033 = vmatpush.bf16.msrb.mxu2 %v2197_v0  ;;  %v2293_v27 = vor.u32 %v2872_v20, %v2290_v21  ;;  %v2904_v55 = vld [vmem:[%s4434_s3 + $0x4] sm:$0xf0]  ;;  %v2917_v57 = vld [vmem:[%s4434_s3 + $0x74] sm:$0xf]  ;;  %v2466_v58 = vld [vmem:[%s4434_s3 + $0x78] sm:$0xf0]  ;;  %v2505_v61 = vor.u32 %v2928_v53, %v2504_v52 }
  0x7b   :  { %1046 = vmatpush.bf16.msrb.mxu3 %v2325_v4  ;;  %v2409_v63 = vor.u32 %v2904_v55, %v2408_v54  ;;  %v2496_v0 = vld [vmem:[%s4434_s3 + $0xb0] sm:$0xf]  ;;  %v2926_v1 = vld [vmem:[%s4434_s3 + $0xb4] sm:$0xf0]  ;;  %v2469_v2 = vor.u32 %v2917_v57, %v2466_v58  ;;  %v2915_v3 = vld [vmem:[%s4434_s3 + $0x64] sm:$0xf] }
  0x7c   :  { %1008 = vmatpush.bf16.msrb.mxu0 %v1925_v10  ;;  %v2458_v4 = vld [vmem:[%s4434_s3 + $0x68] sm:$0xf0]  ;;  %v2497_v5 = vor.u32 %v2926_v1, %v2496_v0  ;;  %v2488_v6 = vld [vmem:[%s4434_s3 + $0xa0] sm:$0xf]  ;;  %v2924_v7 = vld [vmem:[%s4434_s3 + $0xa4] sm:$0xf0] }
  0x7d   :  { %1021 = vmatpush.bf16.msrb.mxu1 %v2053_v12  ;;  %v2461_v8 = vor.u32 %v2915_v3, %v2458_v4  ;;  %v2913_v9 = vld [vmem:[%s4434_s3 + $0x54] sm:$0xf]  ;;  %v2450_v10 = vld [vmem:[%s4434_s3 + $0x58] sm:$0xf0]  ;;  %v2489_v11 = vor.u32 %v2924_v7, %v2488_v6  ;;  %v4025_v12 = vld [vmem:[%s4433_s2] sm:$0xf] }
  0x7e   :  { %1034 = vmatpush.bf16.msrb.mxu2 %v2181_v13  ;;  %v2453_v13 = vor.u32 %v2913_v9, %v2450_v10  ;;  %v2911_v14 = vld [vmem:[%s4434_s3 + $0x44] sm:$0xf]  ;;  %v2442_v15 = vld [vmem:[%s4434_s3 + $0x48] sm:$0xf0]  ;;  %v184_v16 = vperm.slane %v4025_v12, 0 }
  0x7f   :  { %1047 = vmatpush.bf16.msrb.mxu3 %v2309_v17  ;;  %v2445_v17 = vor.u32 %v2911_v14, %v2442_v15  ;;  %v2480_v18 = vld [vmem:[%s4434_s3 + $0x90] sm:$0xf]  ;;  %v2922_v19 = vld [vmem:[%s4434_s3 + $0x94] sm:$0xf0]  ;;  %v2909_v21 = vld [vmem:[%s4434_s3 + $0x34] sm:$0xf] }
  0x80   :  { %1009 = vmatpush.bf16.msrb.mxu0 %v1909_v24  ;;  %v2434_v22 = vld [vmem:[%s4434_s3 + $0x38] sm:$0xf0]  ;;  %v2481_v23 = vor.u32 %v2922_v19, %v2480_v18  ;;  %v2426_v29 = vld [vmem:[%s4434_s3 + $0x28] sm:$0xf0]  ;;  %v2472_v30 = vld [vmem:[%s4434_s3 + $0x80] sm:$0xf] }
  0x81   :  { %1022 = vmatpush.bf16.msrb.mxu1 %v2037_v25  ;;  %v2592_v33 = vld [vmem:[%s4434_s3 + $0x170] sm:$0xf]  ;;  %v2418_v40 = vld [vmem:[%s4434_s3 + $0x18] sm:$0xf0]  ;;  %v2584_v43 = vld [vmem:[%s4434_s3 + $0x160] sm:$0xf] }
  0x82   :  { %1035 = vmatpush.bf16.msrb.mxu2 %v2165_v26  ;;  %v2907_v26 = vld [vmem:[%s4434_s3 + $0x24] sm:$0xf]  ;;  %v2948_v44 = vld [vmem:[%s4434_s3 + $0x164] sm:$0xf0]  ;;  %v2522_v48 = vld [vmem:[%s4434_s3 + $0xe8] sm:$0xf0] }
  0x83   :  { %1048 = vmatpush.bf16.msrb.mxu3 %v2293_v27  ;;  %1010 = vmatmul.bf16.vlgmr.msrb.gmra.mxu0 %v3370_v59  ;;  %v2440_v59 = vld [vmem:[%s4434_s3 + $0x40] sm:$0xf]  ;;  %v2931_v45 = vld [vmem:[%s4434_s3 + $0xe4] sm:$0xf]  ;;  %v2576_v49 = vld [vmem:[%s4434_s3 + $0x150] sm:$0xf] }
  0x84   :  { %1462 = vmatpush.bf16.msra.mxu0 %v2465_v28  ;;  %1023 = vmatmul.bf16.vlgmr.msrb.gmra.mxu1 %v3374_v62  ;;  %v2441_v36 = vor.u32 %v2912_v35, %v2440_v59  ;;  %v2432_v62 = vld [vmem:[%s4434_s3 + $0x30] sm:$0xf]  ;;  %v2437_v28 = vor.u32 %v2909_v21, %v2434_v22  ;;  %v2933_v59 = vld [vmem:[%s4434_s3 + $0xf4] sm:$0xf]  ;;  %v2525_v52 = vor.u32 %v2931_v45, %v2522_v48  ;;  %v2514_v54 = vld [vmem:[%s4434_s3 + $0xd8] sm:$0xf0] }
  0x85   :  { %1036 = vmatmul.bf16.vlgmr.msrb.gmra.mxu2 %v3362_v56  ;;  %v2910_v56 = vld [vmem:[%s4434_s3 + $0x34] sm:$0xf0]  ;;  %v2929_v53 = vld [vmem:[%s4434_s3 + $0xd4] sm:$0xf]  ;;  %v2903_v57 = vld [vmem:[%s4434_s3 + $0x4] sm:$0xf] }
  0x86   :  { %1049 = vmatmul.bf16.vlgmr.msrb.gmra.mxu3 %v3372_v60  ;;  %v2528_v60 = vld [vmem:[%s4434_s3 + $0xf0] sm:$0xf]  ;;  %v2433_v39 = vor.u32 %v2910_v56, %v2432_v62  ;;  %v2530_v62 = vld [vmem:[%s4434_s3 + $0xf8] sm:$0xf0]  ;;  %v2568_v0 = vld [vmem:[%s4434_s3 + $0x140] sm:$0xf] }
  0x87   :  { %v2529_v38 = vor.u32 %v2934_v37, %v2528_v60  ;;  %v2533_v37 = vor.u32 %v2933_v59, %v2530_v62  ;;  %v2944_v1 = vld [vmem:[%s4434_s3 + $0x144] sm:$0xf0]  ;;  %v2927_v4 = vld [vmem:[%s4434_s3 + $0xc4] sm:$0xf]  ;;  %v2560_v14 = vld [vmem:[%s4434_s3 + $0x130] sm:$0xf] }
  0x88   :  { %1463 = vmatpush.bf16.msra.mxu0 %v2457_v31  ;;  %v2920_v31 = vld [vmem:[%s4434_s3 + $0x84] sm:$0xf0]  ;;  %v2942_v15 = vld [vmem:[%s4434_s3 + $0x134] sm:$0xf0]  ;;  %v2498_v18 = vld [vmem:[%s4434_s3 + $0xb8] sm:$0xf0] }
  0x89   :  { %1475 = vmatpush.bf16.msra.mxu1 %v2529_v38  ;;  %v2473_v32 = vor.u32 %v2920_v31, %v2472_v30  ;;  %v2429_v38 = vor.u32 %v2907_v26, %v2426_v29  ;;  %v2552_v19 = vld [vmem:[%s4434_s3 + $0x120] sm:$0xf]  ;;  %v2923_v22 = vld [vmem:[%s4434_s3 + $0xa4] sm:$0xf]  ;;  %v185_v26 = vperm.slane %v4025_v12, 1 }
  0x8a   :  { %v2921_v29 = vld [vmem:[%s4434_s3 + $0x94] sm:$0xf]  ;;  %v2482_v31 = vld [vmem:[%s4434_s3 + $0x98] sm:$0xf0]  ;;  %v2919_v62 = vld [vmem:[%s4434_s3 + $0x84] sm:$0xf] }
  0x8b   :  { %v2648_v48 = vld [vmem:[%s4434_s3 + $0x1e0] sm:$0xf] }
  0x8c   :  { %1464 = vmatpush.bf16.msra.mxu0 %v2449_v34  ;;  %v2950_v34 = vld [vmem:[%s4434_s3 + $0x174] sm:$0xf0] }
  0x8d   :  { %1476 = vmatpush.bf16.msra.mxu1 %v2521_v47  ;;  %v2585_v47 = vor.u32 %v2948_v44, %v2584_v43  ;;  %v2594_v43 = vld [vmem:[%s4434_s3 + $0x178] sm:$0xf0] }
  0x90   :  { %1465 = vmatpush.bf16.msra.mxu0 %v2441_v36  ;;  %v2593_v36 = vor.u32 %v2950_v34, %v2592_v33  ;;  %v2485_v33 = vor.u32 %v2921_v29, %v2482_v31  ;;  %v2608_v29 = vld [vmem:[%s4434_s3 + $0x190] sm:$0xf]  ;;  %v2937_v31 = vld [vmem:[%s4434_s3 + $0x114] sm:$0xf] }
  0x91   :  { %1477 = vmatpush.bf16.msra.mxu1 %v2513_v50  ;;  %v2946_v50 = vld [vmem:[%s4434_s3 + $0x154] sm:$0xf0] }
  0x92   :  { %1488 = vmatpush.bf16.msra.mxu2 %v2593_v36  ;;  %v2577_v58 = vor.u32 %v2946_v50, %v2576_v49  ;;  %v2936_v36 = vld [vmem:[%s4434_s3 + $0x104] sm:$0xf0]  ;;  %v2947_v50 = vld [vmem:[%s4434_s3 + $0x164] sm:$0xf] }
  0x93   :  { %v2964_v49 = vld [vmem:[%s4434_s3 + $0x1e4] sm:$0xf0] }
  0x94   :  { %1466 = vmatpush.bf16.msra.mxu0 %v2433_v39  ;;  %v2905_v39 = vld [vmem:[%s4434_s3 + $0x14] sm:$0xf] }
  0x95   :  { %1478 = vmatpush.bf16.msra.mxu1 %v2505_v61  ;;  %v2421_v55 = vor.u32 %v2905_v39, %v2418_v40  ;;  %v2410_v61 = vld [vmem:[%s4434_s3 + $0x8] sm:$0xf0]  ;;  %v2966_v39 = vld [vmem:[%s4434_s3 + $0x1f4] sm:$0xf0] }
  0x96   :  { %1489 = vmatpush.bf16.msra.mxu2 %v2585_v47  ;;  %v2413_v7 = vor.u32 %v2903_v57, %v2410_v61  ;;  %v2640_v57 = vld [vmem:[%s4434_s3 + $0x1d0] sm:$0xf] }
  0x98   :  { %1467 = vmatpush.bf16.msra.mxu0 %v2425_v42 }
  0x99   :  { %1479 = vmatpush.bf16.msra.mxu1 %v2497_v5  ;;  %v2506_v5 = vld [vmem:[%s4434_s3 + $0xc8] sm:$0xf0] }
  0x9a   :  { %1490 = vmatpush.bf16.msra.mxu2 %v2577_v58  ;;  %v2509_v10 = vor.u32 %v2927_v4, %v2506_v5  ;;  %v2962_v58 = vld [vmem:[%s4434_s3 + $0x1d4] sm:$0xf0]  ;;  %v2632_v4 = vld [vmem:[%s4434_s3 + $0x1c0] sm:$0xf]  ;;  %v2960_v5 = vld [vmem:[%s4434_s3 + $0x1c4] sm:$0xf0] }
  0x9c   :  { %1468 = vmatpush.bf16.msra.mxu0 %v2417_v51  ;;  %v4097_v51 = vld [vmem:[%s4442_s11] sm:$0xff] }
  0x9d   :  { %1480 = vmatpush.bf16.msra.mxu1 %v2489_v11 }
  0xa0   :  { %1469 = vmatpush.bf16.msra.mxu0 %v2409_v63  ;;  %v2517_v63 = vor.u32 %v2929_v53, %v2514_v54  ;;  %v2649_v54 = vor.u32 %v2964_v49, %v2648_v48  ;;  %v2650_v48 = vld [vmem:[%s4434_s3 + $0x1e8] sm:$0xf0] }
  0xa1   :  { %1481 = vmatpush.bf16.msra.mxu1 %v2481_v23  ;;  %v2490_v23 = vld [vmem:[%s4434_s3 + $0xa8] sm:$0xf0] }
  0xa3   :  { %v855_v20 = vpop.f32.mrf.mxu0 }
  0xa4   :  { %1514 = vmatpush.bf16.msrb.mxu0 %v2469_v2  ;;  %v856_v24 = vadd.f32 %v855_v20, %v184_v16  ;;  %v868_v25 = vpop.f32.mrf.mxu1  ;;  %v1060_v2 = vunpack.c.l.bf16 %v4097_v51  ;;  %v2925_v16 = vld [vmem:[%s4434_s3 + $0xb4] sm:$0xf]  ;;  %v2940_v20 = vld [vmem:[%s4434_s3 + $0x124] sm:$0xf0] }
  0xa5   :  { %1482 = vmatpush.bf16.msra.mxu1 %v2473_v32  ;;  %v2501_v21 = vor.u32 %v2925_v16, %v2498_v18  ;;  %v2958_v18 = vld [vmem:[%s4434_s3 + $0x1b4] sm:$0xf0] }
  0xa6   :  { %v869_v27 = vadd.f32 %v868_v25, %v856_v24  ;;  %v2553_v24 = vor.u32 %v2940_v20, %v2552_v19  ;;  %v2493_v25 = vor.u32 %v2923_v22, %v2490_v23  ;;  %v2562_v20 = vld [vmem:[%s4434_s3 + $0x138] sm:$0xf0]  ;;  %v2956_v22 = vld [vmem:[%s4434_s3 + $0x1a4] sm:$0xf0] }
  0xa8   :  { %1515 = vmatpush.bf16.msrb.mxu0 %v2461_v8  ;;  %v881_v35 = vpop.f32.mrf.mxu2  ;;  %v2569_v8 = vor.u32 %v2944_v1, %v2568_v0  ;;  %v2945_v0 = vld [vmem:[%s4434_s3 + $0x154] sm:$0xf]  ;;  %v2578_v1 = vld [vmem:[%s4434_s3 + $0x158] sm:$0xf0] }
  0xa9   :  { %v882_v56 = vadd.f32 %v881_v35, %v869_v27  ;;  %1527 = vmatpush.bf16.msrb.mxu1 %v2533_v37  ;;  %v2544_v27 = vld [vmem:[%s4434_s3 + $0x110] sm:$0xf]  ;;  %v2536_v35 = vld [vmem:[%s4434_s3 + $0x100] sm:$0xf]  ;;  %v2474_v37 = vld [vmem:[%s4434_s3 + $0x88] sm:$0xf0] }
  0xaa   :  { %1491 = vmatpush.bf16.msra.mxu2 %v2569_v8  ;;  %v2477_v40 = vor.u32 %v2919_v62, %v2474_v37  ;;  %v1061_v8 = vunpack.c.h.bf16 %v4097_v51  ;;  %v2941_v51 = vld [vmem:[%s4434_s3 + $0x134] sm:$0xf]  ;;  %v2600_v62 = vld [vmem:[%s4434_s3 + $0x180] sm:$0xf] }
  0xab   :  { %v894_v60 = vpop.f32.mrf.mxu3  ;;  %v857_v42 = vpop.f32.mrf.mxu0  ;;  %v2565_v23 = vor.u32 %v2941_v51, %v2562_v20  ;;  %v2602_v51 = vld [vmem:[%s4434_s3 + $0x188] sm:$0xf0] }
  0xac   :  { %1516 = vmatpush.bf16.msrb.mxu0 %v2453_v13  ;;  %v895_v41 = vadd.f32 %v894_v60, %v882_v56  ;;  %v870_v46 = vpop.f32.mrf.mxu1  ;;  %v2537_v60 = vor.u32 %v2936_v36, %v2536_v35  ;;  %v2949_v42 = vld [vmem:[%s4434_s3 + $0x174] sm:$0xf] }
  0xad   :  { %1528 = vmatpush.bf16.msrb.mxu1 %v2525_v52  ;;  %v2597_v45 = vor.u32 %v2949_v42, %v2594_v43 }
  0xae   :  { %2999 = vtanh.f32 %v895_v41 }
  0xb0   :  { %1517 = vmatpush.bf16.msrb.mxu0 %v2445_v17  ;;  %v883_v3 = vpop.f32.mrf.mxu2  ;;  %v2561_v17 = vor.u32 %v2942_v15, %v2560_v14 }
  0xb1   :  { %1529 = vmatpush.bf16.msrb.mxu1 %v2517_v63  ;;  %v2581_v3 = vor.u32 %v2945_v0, %v2578_v1 }
  0xb2   :  { %1492 = vmatpush.bf16.msra.mxu2 %v2561_v17  ;;  %v2624_v17 = vld [vmem:[%s4434_s3 + $0x1b0] sm:$0xf] }
  0xb3   :  { %v896_v6 = vpop.f32.mrf.mxu3  ;;  %v2625_v19 = vor.u32 %v2958_v18, %v2624_v17  ;;  %v2951_v18 = vld [vmem:[%s4434_s3 + $0x184] sm:$0xf] }
  0xb4   :  { %1518 = vmatpush.bf16.msrb.mxu0 %v2437_v28  ;;  %v3000_v9 = vpop.eup %2999  ;;  %v2938_v28 = vld [vmem:[%s4434_s3 + $0x114] sm:$0xf0]  ;;  %v2943_v6 = vld [vmem:[%s4434_s3 + $0x144] sm:$0xf] }
  0xb5   :  { %v1064_v11 = vmul.f32 %v3000_v9, %v1060_v2  ;;  %1530 = vmatpush.bf16.msrb.mxu1 %v2509_v10  ;;  %v2545_v30 = vor.u32 %v2938_v28, %v2544_v27  ;;  %v2641_v2 = vor.u32 %v2962_v58, %v2640_v57  ;;  %v186_v28 = vperm.slane %v4025_v12, 2  ;;  %v2642_v57 = vld [vmem:[%s4434_s3 + $0x1d8] sm:$0xf0] }
  0xb6   :  { %1493 = vmatpush.bf16.msra.mxu2 %v2553_v24  ;;  %v2939_v24 = vld [vmem:[%s4434_s3 + $0x124] sm:$0xf] }
  0xb7   :  { %v1068_v13 = vpack.c.bf16 %v1064_v11, %v1064_v11  ;;  %v2633_v11 = vor.u32 %v2960_v5, %v2632_v4 }
  0xb8   :  { %1519 = vmatpush.bf16.msrb.mxu0 %v2429_v38  ;;  %v2656_v38 = vld [vmem:[%s4434_s3 + $0x1f0] sm:$0xf] }
  0xb9   :  { %1470 = vmatmul.bf16.vlgmr.msra.gmra.mxu0 %v1068_v13  ;;  %1531 = vmatpush.bf16.msrb.mxu1 %v2501_v21  ;;  %v2657_v41 = vor.u32 %v2966_v39, %v2656_v38  ;;  %v2616_v21 = vld [vmem:[%s4434_s3 + $0x1a0] sm:$0xf]  ;;  %v2538_v38 = vld [vmem:[%s4434_s3 + $0x108] sm:$0xf0]  ;;  %v2965_v39 = vld [vmem:[%s4434_s3 + $0x1f4] sm:$0xf] }
  0xba   :  { %1494 = vmatpush.bf16.msra.mxu2 %v2545_v30  ;;  %v2954_v30 = vld [vmem:[%s4434_s3 + $0x194] sm:$0xf0] }
  0xbb   :  { %1501 = vmatpush.bf16.msra.mxu3 %v2657_v41 }
  0xbc   :  { %1520 = vmatpush.bf16.msrb.mxu0 %v2421_v55  ;;  %v2586_v55 = vld [vmem:[%s4434_s3 + $0x168] sm:$0xf0] }
  0xbd   :  { %1532 = vmatpush.bf16.msrb.mxu1 %v2493_v25  ;;  %v2589_v63 = vor.u32 %v2947_v50, %v2586_v55  ;;  %v2554_v25 = vld [vmem:[%s4434_s3 + $0x128] sm:$0xf0]  ;;  %v2961_v55 = vld [vmem:[%s4434_s3 + $0x1d4] sm:$0xf] }
  0xbe   :  { %1495 = vmatpush.bf16.msra.mxu2 %v2537_v60  ;;  %v2557_v27 = vor.u32 %v2939_v24, %v2554_v25  ;;  %v2935_v60 = vld [vmem:[%s4434_s3 + $0x104] sm:$0xf]  ;;  %v2645_v58 = vor.u32 %v2961_v55, %v2642_v57  ;;  %v1136_v55 = vld [vmem:[%s4435_s4] sm:$0x3] }
  0xbf   :  { %1502 = vmatpush.bf16.msra.mxu3 %v2649_v54  ;;  %v2541_v42 = vor.u32 %v2935_v60, %v2538_v38  ;;  %v1059_v54 = vld [vmem:[%s4442_s11 + $0x8] sm:$0xff] }
  0xc0   :  { %1521 = vmatpush.bf16.msrb.mxu0 %v2413_v7  ;;  %v907_v32 = vpop.f32.mrf.mxu0  ;;  %v2570_v7 = vld [vmem:[%s4434_s3 + $0x148] sm:$0xf0]  ;;  %v1062_v1 = vunpack.c.l.bf16 %v1059_v54 }
  0xc1   :  { %v908_v34 = vadd.f32 %v907_v32, %v185_v26  ;;  %v920_v59 = vpop.f32.mrf.mxu1  ;;  %1533 = vmatpush.bf16.msrb.mxu1 %v2485_v33  ;;  %v2617_v26 = vor.u32 %v2956_v22, %v2616_v21  ;;  %v2609_v32 = vor.u32 %v2954_v30, %v2608_v29  ;;  %v2546_v33 = vld [vmem:[%s4434_s3 + $0x118] sm:$0xf0]  ;;  %v2605_v22 = vor.u32 %v2951_v18, %v2602_v51 }
  0xc2   :  { %1540 = vmatpush.bf16.msrb.mxu2 %v2597_v45  ;;  %v1063_v30 = vunpack.c.h.bf16 %v1059_v54  ;;  %v2978_v54 = vld [vmem:[%s4436_s5 + $0x58] sm:$0xff] }
  0xc3   :  { %v921_v56 = vadd.f32 %v920_v59, %v908_v34  ;;  %1503 = vmatpush.bf16.msra.mxu3 %v2641_v2  ;;  %v2549_v34 = vor.u32 %v2937_v31, %v2546_v33 }
  0xc5   :  { %1534 = vmatpush.bf16.msrb.mxu1 %v2477_v40  ;;  %v2658_v40 = vld [vmem:[%s4434_s3 + $0x1f8] sm:$0xf0] }
  0xc6   :  { %1541 = vmatpush.bf16.msrb.mxu2 %v2589_v63  ;;  %v2661_v43 = vor.u32 %v2965_v39, %v2658_v40  ;;  %v2634_v63 = vld [vmem:[%s4434_s3 + $0x1c8] sm:$0xf0]  ;;  %v2973_v39 = vld [vmem:[%s4436_s5 + $0x30] sm:$0xff] }
  0xc7   :  { %1504 = vmatpush.bf16.msra.mxu3 %v2633_v11  ;;  %v2618_v11 = vld [vmem:[%s4434_s3 + $0x1a8] sm:$0xf0] }
  0xc8   :  { %v933_v44 = vpop.f32.mrf.mxu2  ;;  %v909_v53 = vpop.f32.mrf.mxu0  ;;  %v2972_v40 = vld [vmem:[%s4436_s5 + $0x28] sm:$0xff] }
  0xc9   :  { %v934_v46 = vadd.f32 %v933_v44, %v921_v56  ;;  %v946_v47 = vpop.f32.mrf.mxu3  ;;  %1522 = vmatmul.bf16.vlgmr.msrb.gmra.mxu0 %v1068_v13  ;;  %v922_v61 = vpop.f32.mrf.mxu1  ;;  %v2573_v13 = vor.u32 %v2943_v6, %v2570_v7  ;;  %v2952_v56 = vld [vmem:[%s4434_s3 + $0x184] sm:$0xf0]  ;;  %v2957_v6 = vld [vmem:[%s4434_s3 + $0x1b4] sm:$0xf]  ;;  %v2626_v7 = vld [vmem:[%s4434_s3 + $0x1b8] sm:$0xf0] }
  0xca   :  { %1542 = vmatpush.bf16.msrb.mxu2 %v2581_v3  ;;  %v2601_v37 = vor.u32 %v2952_v56, %v2600_v62  ;;  %v2959_v61 = vld [vmem:[%s4434_s3 + $0x1c4] sm:$0xf] }
  0xcb   :  { %v947_v52 = vadd.f32 %v946_v47, %v934_v46  ;;  %1505 = vmatpush.bf16.msra.mxu3 %v2625_v19  ;;  %v2963_v47 = vld [vmem:[%s4434_s3 + $0x1e4] sm:$0xf]  ;;  %v2637_v2 = vor.u32 %v2959_v61, %v2634_v63  ;;  %v2976_v61 = vld [vmem:[%s4436_s5 + $0x48] sm:$0xff]  ;;  %v1138_v63 = vperm.slane %v1136_v55, 0 }
  0xcc   :  { %v2653_v49 = vor.u32 %v2963_v47, %v2650_v48  ;;  %v2981_v47 = vld [vmem:[%s4436_s5 + $0x70] sm:$0xff]  ;;  %v2968_v48 = vld [vmem:[%s4436_s5 + $0x8] sm:$0xff] }
  0xcd   :  { %3001 = vtanh.f32 %v947_v52 }
  0xce   :  { %1543 = vmatpush.bf16.msrb.mxu2 %v2573_v13 }
  0xcf   :  { %1506 = vmatpush.bf16.msra.mxu3 %v2617_v26 }
  0xd0   :  { %v935_v9 = vpop.f32.mrf.mxu2 }
  0xd1   :  { %v948_v10 = vpop.f32.mrf.mxu3  ;;  %v2629_v9 = vor.u32 %v2957_v6, %v2626_v7 }
  0xd2   :  { %1544 = vmatpush.bf16.msrb.mxu2 %v2565_v23  ;;  %v2955_v10 = vld [vmem:[%s4434_s3 + $0x1a4] sm:$0xf] }
  0xd3   :  { %v3002_v14 = vpop.eup %3001  ;;  %1507 = vmatpush.bf16.msra.mxu3 %v2609_v32  ;;  %v2621_v13 = vor.u32 %v2955_v10, %v2618_v11  ;;  %v1139_v10 = vperm.slane %v1136_v55, 1 }
  0xd4   :  { %v1065_v15 = vmul.f32 %v3002_v14, %v1061_v8  ;;  %v2953_v14 = vld [vmem:[%s4434_s3 + $0x194] sm:$0xf] }
  0xd6   :  { %v1069_v16 = vpack.c.bf16 %v1065_v15, %v1065_v15  ;;  %1545 = vmatpush.bf16.msrb.mxu2 %v2557_v27  ;;  %v2610_v15 = vld [vmem:[%s4434_s3 + $0x198] sm:$0xf0]  ;;  %s3041_s3 = smov [#allocation2]  }
  0xd7   :  { %1508 = vmatpush.bf16.msra.mxu3 %v2601_v37  ;;  %v2613_v17 = vor.u32 %v2953_v14, %v2610_v15  ;;  %v2974_v37 = vld [vmem:[%s4436_s5 + $0x38] sm:$0xff] }
  0xd8   :  { %1483 = vmatmul.bf16.vlgmr.msra.gmra.mxu1 %v1069_v16  ;;  %1707 = vmatpush.bf16.msra.mxu0 %v2974_v37 }
  0xda   :  { %1546 = vmatpush.bf16.msrb.mxu2 %v2549_v34 }
  0xdb   :  { %1553 = vmatpush.bf16.msrb.mxu3 %v2661_v43  ;;  %v2982_v43 = vld [vmem:[%s4436_s5 + $0x78] sm:$0xff] }
  0xdc   :  { %1708 = vmatpush.bf16.msra.mxu0 %v2973_v39  ;;  %1720 = vmatpush.bf16.msra.mxu1 %v2982_v43  ;;  %v2997_v43 = vld [vmem:[%s4439_s8] ss:$0 sm:$0xff]  ;;  %s1883_s8 = sshll.u32 %s3041_s3, 4  ;;  %s1884_s8 = int_to_ptr.vmem [resolvable:$true] %s1883_s8 }
  0xde   :  { %1547 = vmatpush.bf16.msrb.mxu2 %v2541_v42  ;;  %v2971_v42 = vld [vmem:[%s4436_s5 + $0x20] sm:$0xff] }
  0xdf   :  { %1554 = vmatpush.bf16.msrb.mxu3 %v2653_v49  ;;  %v2980_v49 = vld [vmem:[%s4436_s5 + $0x68] sm:$0xff] }
  0xe0   :  { %v959_v59 = vpop.f32.mrf.mxu0  ;;  %1709 = vmatpush.bf16.msra.mxu0 %v2972_v40  ;;  %1721 = vmatpush.bf16.msra.mxu1 %v2981_v47  ;;  %v2993_v40 = vld [vmem:[%s4440_s9 + $0x10] sm:$0xff] }
  0xe1   :  { %v960_v35 = vadd.f32 %v959_v59, %v186_v28  ;;  %v972_v36 = vpop.f32.mrf.mxu1 }
  0xe3   :  { %v973_v41 = vadd.f32 %v972_v36, %v960_v35  ;;  %1555 = vmatpush.bf16.msrb.mxu3 %v2645_v58  ;;  %v2977_v58 = vld [vmem:[%s4436_s5 + $0x50] sm:$0xff] }
  0xe4   :  { %1710 = vmatpush.bf16.msra.mxu0 %v2971_v42  ;;  %1722 = vmatpush.bf16.msra.mxu1 %v2980_v49  ;;  %v2991_v42 = vld [vmem:[%s4440_s9] sm:$0xff] }
  0xe7   :  { %1556 = vmatpush.bf16.msrb.mxu3 %v2637_v2 }
  0xe8   :  { %v985_v44 = vpop.f32.mrf.mxu2  ;;  %1535 = vmatmul.bf16.vlgmr.msrb.gmra.mxu1 %v1069_v16  ;;  %v961_v52 = vpop.f32.mrf.mxu0  ;;  %v187_v16 = vperm.slane %v4025_v12, 3 }
  0xe9   :  { %v986_v45 = vadd.f32 %v985_v44, %v973_v41  ;;  %v998_v46 = vpop.f32.mrf.mxu3  ;;  %v974_v53 = vpop.f32.mrf.mxu1  ;;  %v2970_v44 = vld [vmem:[%s4436_s5 + $0x18] sm:$0xff]  ;;  %v2979_v52 = vld [vmem:[%s4436_s5 + $0x60] sm:$0xff] }
  0xea   :  { %1711 = vmatpush.bf16.msra.mxu0 %v2970_v44  ;;  %1723 = vmatpush.bf16.msra.mxu1 %v2979_v52 }
  0xeb   :  { %v999_v50 = vadd.f32 %v998_v46, %v986_v45  ;;  %1557 = vmatpush.bf16.msrb.mxu3 %v2629_v9  ;;  %v2969_v46 = vld [vmem:[%s4436_s5 + $0x10] sm:$0xff] }
  0xed   :  { %3003 = vtanh.f32 %v999_v50  ;;  %v2967_v50 = vld [vmem:[%s4436_s5] sm:$0xff] }
  0xee   :  { %1712 = vmatpush.bf16.msra.mxu0 %v2969_v46  ;;  %1724 = vmatpush.bf16.msra.mxu1 %v2978_v54  ;;  %v1820_v46 = vld [vmem:[%s4445_s14] sm:$0xf] }
  0xef   :  { %1558 = vmatpush.bf16.msrb.mxu3 %v2621_v13  ;;  %v1821_v47 = vunpack.c.l.bf16 %v1820_v46 }
  0xf0   :  { %v987_v0 = vpop.f32.mrf.mxu2 }
  0xf1   :  { %v1000_v3 = vpop.f32.mrf.mxu3  ;;  %v2975_v0 = vld [vmem:[%s4436_s5 + $0x40] sm:$0xff] }
  0xf2   :  { %1713 = vmatpush.bf16.msra.mxu0 %v2968_v48  ;;  %1725 = vmatpush.bf16.msra.mxu1 %v2977_v58 }
  0xf3   :  { %v3004_v4 = vpop.eup %3003  ;;  %1559 = vmatpush.bf16.msrb.mxu3 %v2613_v17 }
  0xf4   :  { %v1066_v5 = vmul.f32 %v3004_v4, %v1062_v1  ;;  %v2990_v4 = vld [vmem:[%s4438_s7 + $0x38] sm:$0xff] }
  0xf6   :  { %v1070_v8 = vpack.c.bf16 %v1066_v5, %v1066_v5  ;;  %1714 = vmatpush.bf16.msra.mxu0 %v2967_v50  ;;  %1726 = vmatpush.bf16.msra.mxu1 %v2976_v61 }
  0xf7   :  { %1560 = vmatpush.bf16.msrb.mxu3 %v2605_v22 }
  0xf8   :  { %1496 = vmatmul.bf16.vlgmr.msra.gmra.mxu2 %v1070_v8 }
  0xf9   :  { %1806 = vmatpush.bf16.msra.mxu2 %v2990_v4 }
  0xfa   :  { %1727 = vmatpush.bf16.msra.mxu1 %v2975_v0 }
 0x100   :  { %v1011_v19 = vpop.f32.mrf.mxu0 }
 0x101   :  { %v1012_v20 = vadd.f32 %v1011_v19, %v187_v16  ;;  %v1024_v21 = vpop.f32.mrf.mxu1 }
 0x103   :  { %v1025_v23 = vadd.f32 %v1024_v21, %v1012_v20 }
 0x108   :  { %v1037_v24 = vpop.f32.mrf.mxu2  ;;  %v1013_v26 = vpop.f32.mrf.mxu0  ;;  %1548 = vmatmul.bf16.vlgmr.msrb.gmra.mxu2 %v1070_v8  ;;  %v1568_v8 = vld [vmem:[%s4443_s12] sm:$0xff] }
 0x109   :  { %v1038_v25 = vadd.f32 %v1037_v24, %v1025_v23  ;;  %v1050_v12 = vpop.f32.mrf.mxu3  ;;  %v1026_v27 = vpop.f32.mrf.mxu1  ;;  %v1569_v9 = vunpack.c.l.bf16 %v1568_v8  ;;  %v1570_v20 = vunpack.c.h.bf16 %v1568_v8  ;;  %v2987_v26 = vld [vmem:[%s4438_s7 + $0x20] sm:$0xff] }
 0x10a   :  { %v2986_v27 = vld [vmem:[%s4438_s7 + $0x18] sm:$0xff] }
 0x10b   :  { %v1051_v28 = vadd.f32 %v1050_v12, %v1038_v25  ;;  %v2989_v25 = vld [vmem:[%s4438_s7 + $0x30] sm:$0xff]  ;;  %v2988_v12 = vld [vmem:[%s4438_s7 + $0x28] sm:$0xff] }
 0x10c   :  { %1807 = vmatpush.bf16.msra.mxu2 %v2989_v25 }
 0x10d   :  { %3005 = vtanh.f32 %v1051_v28  ;;  %v2985_v28 = vld [vmem:[%s4438_s7 + $0x10] sm:$0xff] }
 0x110   :  { %v1039_v29 = vpop.f32.mrf.mxu2  ;;  %1808 = vmatpush.bf16.msra.mxu2 %v2988_v12 }
 0x111   :  { %v1052_v31 = vpop.f32.mrf.mxu3  ;;  %v2984_v29 = vld [vmem:[%s4438_s7 + $0x8] sm:$0xff] }
 0x112   :  { %v2994_v31 = vld [vmem:[%s4440_s9 + $0x18] sm:$0xff] }
 0x113   :  { %v3006_v32 = vpop.eup %3005 }
 0x114   :  { %v1067_v33 = vmul.f32 %v3006_v32, %v1063_v30  ;;  %1809 = vmatpush.bf16.msra.mxu2 %v2987_v26  ;;  %v2983_v30 = vld [vmem:[%s4438_s7] sm:$0xff] }
 0x116   :  { %v1071_v34 = vpack.c.bf16 %v1067_v33, %v1067_v33 }
 0x118   :  { %1509 = vmatmul.bf16.vlgmr.msra.gmra.mxu3 %v1071_v34  ;;  %1810 = vmatpush.bf16.msra.mxu2 %v2986_v27 }
 0x119   :  { %1868 = vmatpush.bf16.msra.mxu3 %v2994_v31 }
 0x11c   :  { %1811 = vmatpush.bf16.msra.mxu2 %v2985_v28 }
 0x11d   :  { %1869 = vmatpush.bf16.msra.mxu3 %v2993_v40 }
 0x120   :  { %1812 = vmatpush.bf16.msra.mxu2 %v2984_v29 }
 0x124   :  { %1813 = vmatpush.bf16.msra.mxu2 %v2983_v30 }
 0x128   :  { %1561 = vmatmul.bf16.vlgmr.msrb.gmra.mxu3 %v1071_v34  ;;  %v2996_v34 = vld [vmem:[%s4437_s6] ss:$0 sm:$0xff] }
 0x136   :  { %v1471_v59 = vpop.f32.mrf.mxu0 }
 0x137   :  { %v1472_v1 = vadd.f32 %v1471_v59, %v1138_v63 }
 0x13e   :  { %v1473_v35 = vpop.f32.mrf.mxu0 }
 0x146   :  { %v1523_v36 = vpop.f32.mrf.mxu0 }
 0x147   :  { %v1524_v15 = vadd.f32 %v1523_v36, %v1139_v10 }
 0x14e   :  { %v1525_v62 = vpop.f32.mrf.mxu0 }
 0x14f   :  { %v1734_v62 = vld [vmem:[%s4444_s13] sm:$0xf] }
 0x155   :  { %v1484_v56 = vpop.f32.mrf.mxu1 }
 0x156   :  { %v1485_v3 = vadd.f32 %v1484_v56, %v1472_v1  ;;  %v1735_v56 = vunpack.c.l.bf16 %v1734_v62 }
 0x15d   :  { %v1486_v60 = vpop.f32.mrf.mxu1 }
 0x165   :  { %v1536_v38 = vpop.f32.mrf.mxu1 }
 0x166   :  { %v1537_v17 = vadd.f32 %v1536_v38, %v1524_v15 }
 0x16d   :  { %v1538_v41 = vpop.f32.mrf.mxu1 }
 0x16e   :  { %v2992_v41 = vld [vmem:[%s4440_s9 + $0x8] sm:$0xff] }
 0x16f   :  { %1870 = vmatpush.bf16.msra.mxu3 %v2992_v41 }
 0x173   :  { %1871 = vmatpush.bf16.msra.mxu3 %v2991_v42 }
 0x17b   :  { %v1497_v45 = vpop.f32.mrf.mxu2 }
 0x17c   :  { %v1498_v5 = vadd.f32 %v1497_v45, %v1485_v3 }
 0x183   :  { %v1499_v53 = vpop.f32.mrf.mxu2 }
 0x184   :  { %v2998_v53 = vld [vmem:[%s4441_s10] ss:$0 sm:$0xff] }
 0x18b   :  { %v1549_v57 = vpop.f32.mrf.mxu2 }
 0x18c   :  { %v1550_v18 = vadd.f32 %v1549_v57, %v1537_v17 }
 0x193   :  { %v1551_v2 = vpop.f32.mrf.mxu2 }
 0x19b   :  { %v1510_v6 = vpop.f32.mrf.mxu3 }
 0x19c   :  { %v1511_v7 = vadd.f32 %v1510_v6, %v1498_v5 }
 0x19e   :  { %3007 = vtanh.f32 %v1511_v7 }
 0x1a3   :  { %v1512_v11 = vpop.f32.mrf.mxu3 }
 0x1a4   :  { %v3008_v13 = vpop.eup %3007 }
 0x1a5   :  { %v1571_v14 = vmul.f32 %v3008_v13, %v1569_v9 }
 0x1a7   :  { %v1573_v16 = vpack.c.bf16 %v1571_v14, %v1571_v14 }
 0x1a9   :  { %1715 = vmatmul.bf16.vlgmr.msra.gmra.mxu0 %v1573_v16 }
 0x1ab   :  { %v1562_v51 = vpop.f32.mrf.mxu3 }
 0x1ac   :  { %v1563_v19 = vadd.f32 %v1562_v51, %v1550_v18 }
 0x1ae   :  { %3009 = vtanh.f32 %v1563_v19 }
 0x1b3   :  { %v1564_v21 = vpop.f32.mrf.mxu3 }
 0x1b4   :  { %v3010_v22 = vpop.eup %3009 }
 0x1b5   :  { %v1572_v23 = vmul.f32 %v3010_v22, %v1570_v20 }
 0x1b7   :  { %v1574_v24 = vpack.c.bf16 %v1572_v23, %v1572_v23 }
 0x1b9   :  { %1728 = vmatmul.bf16.vlgmr.msra.gmra.mxu1 %v1574_v24 }
 0x226   :  { %v1716_v32 = vpop.f32.mrf.mxu0 }
 0x227   :  { %v1717_v59 = vadd.f32 %v2996_v34, %v1716_v32 }
 0x22e   :  { %v1718_v33 = vpop.f32.mrf.mxu0 }
 0x236   :  { %v1729_v35 = vpop.f32.mrf.mxu1 }
 0x237   :  { %v1730_v36 = vadd.f32 %v1729_v35, %v1717_v59 }
 0x239   :  { %3011 = vtanh.f32 %v1730_v36 }
 0x23e   :  { %v1731_v60 = vpop.f32.mrf.mxu1 }
 0x23f   :  { %v3012_v37 = vpop.eup %3011 }
 0x240   :  { %v1736_v38 = vmul.f32 %v3012_v37, %v1735_v56 }
 0x242   :  { %v1737_v39 = vpack.c.bf16 %v1736_v38, %v1736_v38 }
 0x244   :  { %1814 = vmatmul.bf16.vlgmr.msra.gmra.mxu2 %v1737_v39 }
 0x2c7   :  { %v1815_v44 = vpop.f32.mrf.mxu2 }
 0x2c8   :  { %v1816_v45 = vadd.f32 %v2997_v43, %v1815_v44 }
 0x2ca   :  { %3013 = vtanh.f32 %v1816_v45 }
 0x2cf   :  { %v1817_v48 = vpop.f32.mrf.mxu2 }
 0x2d0   :  { %v3014_v49 = vpop.eup %3013 }
 0x2d1   :  { %v1822_v50 = vmul.f32 %v3014_v49, %v1821_v47 }
 0x2d3   :  { %v1823_v52 = vpack.c.bf16 %v1822_v50, %v1822_v50 }
 0x2d5   :  { %2774 = vmatmul.msk.bf16.vlgmr.msra.gmra.mxu3 %vm1860_vm0, %v1823_v52 }
 0x358   :  { %v1873_v54 = vpop.f32.mrf.mxu3 }
 0x359   :  { %v1874_v55 = vadd.f32 %v2998_v53, %v1873_v54 }
 0x35b   :  { %1877 = vst [vmem:[#allocation2] sm:$0xff] %v1874_v55 }
 0x35c   :  { %1888 = dma.vmem_to_hbm [thread:$0]  %s1884_s8, 128, %s1886_s28, [#allocation3]  }
 0x360   :  { %v1875_v57 = vpop.f32.mrf.mxu3 }
 0x361   :  { %3039 = dma.done.wait [#allocation3], 128  }
 0x362   :  { %3040 = vsyncadd [#allocation3], 4294967168 }
 0x363   :  { %1893 = vsyncpa [#allocation3], 1 }

</bundles_post_ra>
